<compile_context>
chip_gen: v7x
topology: tpu7x:2x2x1
jax: 0.10.0
libtpu: 0.0.40
codegen_flags: <defaults>
</compile_context>

<pallas_src>
import math

import jax
import jax.numpy as jnp
import numpy as np
from jax.experimental import pallas as pl
from jax.experimental.pallas import tpu as pltpu


def _round_up(x, m):
    return ((x + m - 1) // m) * m


def _pick_hid_tile(hid, max_tile=512):
    """Largest lane-aligned (multiple-of-128) tile that evenly divides `hid`.

    The hidden (contraction) dimension is tiled, so partial blocks are not
    allowed there (Pallas pads partial blocks with unspecified values, which
    would corrupt the accumulation).  Fall back to the full hidden dim when no
    aligned divisor exists.
    """
    for cand in (max_tile, 384, 256, 128):
        if cand <= hid and hid % cand == 0:
            return cand
    return hid


# ---------------------------------------------------------------------------
# Pallas kernel: fused  x @ W1 + b1 -> GELU -> @ W2 + b2   (hid-chunked)
# ---------------------------------------------------------------------------
def _mlp_kernel(x_ref, w1_ref, b1_ref, w2_ref, b2_ref, o_ref, acc_ref):
    j = pl.program_id(1)

    @pl.when(j == 0)
    def _():
        acc_ref[...] = jnp.zeros_like(acc_ref)

    # Linear 1: native-dtype operands on the MXU, f32 accumulation.
    h = jnp.dot(x_ref[...], w1_ref[...], preferred_element_type=jnp.float32)
    h = h + b1_ref[...]                          # b1 already f32

    # Exact (erf-based) GELU in f32 -- matches torch.nn.GELU() default.
    h = 0.5 * h * (1.0 + jax.lax.erf(h * (1.0 / math.sqrt(2.0))))

    # Dropout(p=0.0) / eval mode is the identity -> elided from the kernel.
    # TODO(synk): training-mode dropout (p>0) would need pltpu.prng_seed +
    # pltpu.prng_random_bits with a scalar-prefetched seed.

    # Linear 2 partial product: cast h back to the weight dtype so the second
    # matmul also runs on the full-rate MXU path; accumulate in f32.
    acc_ref[...] += jnp.dot(h.astype(w2_ref.dtype), w2_ref[...],
                            preferred_element_type=jnp.float32)

    @pl.when(j == pl.num_programs(1) - 1)
    def _():
        o_ref[...] = (acc_ref[...] + b2_ref[...]).astype(o_ref.dtype)


# ---------------------------------------------------------------------------
# Wrapper
# ---------------------------------------------------------------------------
def mlp_forward(x, w1, b1, w2, b2, *, block_m=256, block_h=512):
    """Fused MLP forward.  x: (..., Fin) -> (..., Fout)."""
    fin = x.shape[-1]
    hid = w1.shape[1]
    fout = w2.shape[1]
    lead = x.shape[:-1]

    x2 = x.reshape(-1, fin)
    m = x2.shape[0]

    # Row tile: multiple of 8 sublanes, at most block_m.  No host-side pad:
    # Pallas masks the ragged tail block's out-of-bounds stores.
    tm = min(block_m, _round_up(m, 8))
    thid = _pick_hid_tile(hid, block_h)

    grid = (pl.cdiv(m, tm), hid // thid)

    # Biases pre-cast to the f32 compute dtype (no per-step astype in-kernel).
    b1f = b1.reshape(1, hid).astype(jnp.float32)
    b2f = b2.reshape(1, fout).astype(jnp.float32)

    itemsize = jnp.dtype(x.dtype).itemsize
    # VMEM budget: double-buffered in/out tiles + f32 accumulator + live f32
    # intermediates, with 1.5x headroom; clamp to [32 MiB, 64 MiB] (64 MiB =
    # physical VMEM per TensorCore on v7x).
    need = (2 * (tm * fin + fin * thid + 8 * thid + thid * fout
                 + 8 * fout + tm * fout) * itemsize
            + tm * fout * 4                      # accumulator scratch
            + tm * thid * 4 + tm * fout * 4)     # live f32 intermediates
    vmem_limit = int(min(max(need * 3 // 2, 32 << 20), 64 << 20))

    cost = pl.CostEstimate(
        flops=int(2 * m * (fin * hid + hid * fout)),
        transcendentals=int(m * hid),
        bytes_accessed=int(itemsize * (m * fin + m * fout + fin * hid
                                       + hid * fout) + 4 * (hid + fout)),
    )

    out = pl.pallas_call(
        _mlp_kernel,
        out_shape=jax.ShapeDtypeStruct((m, fout), x.dtype),
        grid_spec=pltpu.PrefetchScalarGridSpec(
            num_scalar_prefetch=0,
            grid=grid,
            in_specs=[
                pl.BlockSpec((tm, fin), lambda i, j: (i, 0)),      # activations
                pl.BlockSpec((fin, thid), lambda i, j: (0, j)),    # W1 hid-chunk
                pl.BlockSpec((1, thid), lambda i, j: (0, j)),      # b1 hid-chunk (f32)
                pl.BlockSpec((thid, fout), lambda i, j: (j, 0)),   # W2 hid-chunk
                pl.BlockSpec((1, fout), lambda i, j: (0, 0)),      # b2 (f32, resident)
            ],
            out_specs=pl.BlockSpec((tm, fout), lambda i, j: (i, 0)),
            scratch_shapes=[pltpu.VMEM((tm, fout), jnp.float32)],
        ),
        compiler_params=pltpu.CompilerParams(
            dimension_semantics=("parallel", "arbitrary"),
            vmem_limit_bytes=vmem_limit),
        cost_estimate=cost,
    )(x2, w1, b1f, w2, b2f)

    return out.reshape(*lead, fout)


# ---------------------------------------------------------------------------
# Pure-JAX reference (for numerical validation)
# ---------------------------------------------------------------------------
def ref_mlp(x, w1, b1, w2, b2):
    h = x @ w1 + b1
    h = jax.nn.gelu(h, approximate=False)        # exact GELU like nn.GELU()
    return h @ w2 + b2                           # dropout(p=0) == identity


# ---------------------------------------------------------------------------
# Parameter init (matches nn.Linear layout: y = x @ W^T + b; we store W^T)
# ---------------------------------------------------------------------------
def init_mlp_params(key, fin, hid, fout):
    k1, k2, k3, k4 = jax.random.split(key, 4)
    lim1 = 1.0 / math.sqrt(fin)
    lim2 = 1.0 / math.sqrt(hid)
    w1 = jax.random.uniform(k1, (fin, hid), jnp.float32, -lim1, lim1)
    b1 = jax.random.uniform(k2, (hid,), jnp.float32, -lim1, lim1)
    w2 = jax.random.uniform(k3, (hid, fout), jnp.float32, -lim2, lim2)
    b2 = jax.random.uniform(k4, (fout,), jnp.float32, -lim2, lim2)
    return w1, b1, w2, b2


# ---------------------------------------------------------------------------
if __name__ == "__main__":
    key = jax.random.PRNGKey(0)
    fwd = jax.jit(mlp_forward)

    # Case A: lane-dense f32 (B=2, S=128, in=128, hid=256, out=128).
    ka, kp_a, key = jax.random.split(key, 3)
    B, S, FIN, HID, FOUT = 2, 128, 128, 256, 128
    x_a = jax.random.normal(ka, (B, S, FIN), jnp.float32)
    p_a = init_mlp_params(kp_a, FIN, HID, FOUT)
    out_a = jax.block_until_ready(fwd(x_a, *p_a))
    assert out_a.shape == (B, S, FOUT), out_a.shape
    ref_a = jax.block_until_ready(ref_mlp(x_a, *p_a))
    np.testing.assert_allclose(np.asarray(out_a), np.asarray(ref_a),
                               rtol=1e-3, atol=1e-3)

    # Case B: tiny / unaligned shapes (hid_feat=out_feat default to in_feat).
    kb, kp_b, key = jax.random.split(key, 3)
    Bb, Sb, FINb = 2, 8, 32
    x_b = jax.random.normal(kb, (Bb, Sb, FINb), jnp.float32)
    p_b = init_mlp_params(kp_b, FINb, FINb, FINb)
    out_b = jax.block_until_ready(fwd(x_b, *p_b))
    assert out_b.shape == (Bb, Sb, FINb), out_b.shape
    ref_b = jax.block_until_ready(ref_mlp(x_b, *p_b))
    np.testing.assert_allclose(np.asarray(out_b), np.asarray(ref_b),
                               rtol=1e-3, atol=1e-3)

    # Case C: bf16 model, ragged rows (m=400, tm=256) + hid tiling (1024/512).
    kc, kp_c, key = jax.random.split(key, 3)
    Bc, Sc, FINc, HIDc, FOUTc = 2, 200, 128, 1024, 256
    x_c = jax.random.normal(kc, (Bc, Sc, FINc), jnp.float32).astype(jnp.bfloat16)
    w1c, b1c, w2c, b2c = init_mlp_params(kp_c, FINc, HIDc, FOUTc)
    w1c, b1c, w2c, b2c = (w1c.astype(jnp.bfloat16), b1c.astype(jnp.bfloat16),
                          w2c.astype(jnp.bfloat16), b2c.astype(jnp.bfloat16))
    out_c = jax.block_until_ready(fwd(x_c, w1c, b1c, w2c, b2c))
    assert out_c.shape == (Bc, Sc, FOUTc), out_c.shape
    ref_c = ref_mlp(x_c.astype(jnp.float32), w1c.astype(jnp.float32),
                    b1c.astype(jnp.float32), w2c.astype(jnp.float32),
                    b2c.astype(jnp.float32))
    np.testing.assert_allclose(np.asarray(out_c, dtype=np.float32),
                               np.asarray(ref_c), rtol=2e-2, atol=2e-2)

    print("KERNEL_OK")
</pallas_src>

<mosaic_0001>
module attributes {stable_mosaic.version = 11 : i64} {
  func.func @_mlp_kernel(%arg0: i32, %arg1: i32, %arg2: memref<256x128xf32, #tpu.memory_space<vmem>>, %arg3: memref<128x256xf32, #tpu.memory_space<vmem>>, %arg4: memref<1x256xf32, #tpu.memory_space<vmem>>, %arg5: memref<256x128xf32, #tpu.memory_space<vmem>>, %arg6: memref<1x128xf32, #tpu.memory_space<vmem>>, %arg7: memref<256x128xf32, #tpu.memory_space<vmem>>, %arg8: memref<256x128xf32, #tpu.memory_space<vmem>>) attributes {dimension_semantics = [#tpu.dimension_semantics<parallel>, #tpu.dimension_semantics<arbitrary>], iteration_bounds = array<i64: 1, 1>, scalar_prefetch = 0 : i64, scratch_operands = 1 : i64, tpu.core_type = #tpu.core_type<tc>, window_params = [{transform_indices = @transform_0, window_bounds = array<i64: 256, 128>}, {transform_indices = @transform_1, window_bounds = array<i64: 128, 256>}, {transform_indices = @transform_2, window_bounds = array<i64: 1, 256>}, {transform_indices = @transform_3, window_bounds = array<i64: 256, 128>}, {pipeline_mode = #tpu.pipeline_mode<synchronous>, transform_indices = @transform_4, window_bounds = array<i64: 1, 128>}, {transform_indices = @transform_5, window_bounds = array<i64: 256, 128>}]} {
    %c0_i32 = arith.constant 0 : i32
    %0 = arith.cmpi eq, %arg1, %c0_i32 : i32
    %1 = arith.extui %0 : i1 to i32
    %c0_i32_0 = arith.constant 0 : i32
    %2 = arith.cmpi ne, %1, %c0_i32_0 : i32
    scf.if %2 {
      %cst_18 = arith.constant 0.000000e+00 : f32
      %25 = vector.broadcast %cst_18 : f32 to vector<256x128xf32>
      %c0_19 = arith.constant 0 : index
      %c0_20 = arith.constant 0 : index
      %26 = vector.load %arg8[%c0_19, %c0_20] : memref<256x128xf32, #tpu.memory_space<vmem>>, vector<256x128xf32>
      tpu.vector_store %arg8[%c0_19, %c0_20], %25 {strides = array<i32>} : memref<256x128xf32, #tpu.memory_space<vmem>>, vector<256x128xf32>,
    } else {
    }
    %c0 = arith.constant 0 : index
    %c0_1 = arith.constant 0 : index
    %3 = vector.load %arg2[%c0, %c0_1] : memref<256x128xf32, #tpu.memory_space<vmem>>, vector<256x128xf32>
    %c0_2 = arith.constant 0 : index
    %c0_3 = arith.constant 0 : index
    %4 = vector.load %arg3[%c0_2, %c0_3] : memref<128x256xf32, #tpu.memory_space<vmem>>, vector<128x256xf32>
    %cst = arith.constant dense<0.000000e+00> : vector<256x256xf32>
    %5 = tpu.matmul %3, %4, %cst {dimension_numbers = #tpu.dot_dimension_numbers<[1], [0], [0], [1], [0, 0, 1, 1], [], []>} : vector<256x128xf32>, vector<128x256xf32>, vector<256x256xf32> -> vector<256x256xf32>
    %c0_4 = arith.constant 0 : index
    %c0_5 = arith.constant 0 : index
    %6 = vector.load %arg4[%c0_4, %c0_5] : memref<1x256xf32, #tpu.memory_space<vmem>>, vector<1x256xf32>
    %7 = vector.broadcast %6 : vector<1x256xf32> to vector<256x256xf32>
    %8 = arith.addf %5, %7 : vector<256x256xf32>
    %cst_6 = arith.constant 5.000000e-01 : f32
    %9 = vector.broadcast %cst_6 : f32 to vector<256x256xf32>
    %10 = arith.mulf %9, %8 : vector<256x256xf32>
    %cst_7 = arith.constant 0.707106769 : f32
    %11 = vector.broadcast %cst_7 : f32 to vector<256x256xf32>
    %12 = arith.mulf %8, %11 : vector<256x256xf32>
    %13 = math.erf %12 : vector<256x256xf32>
    %cst_8 = arith.constant 1.000000e+00 : f32
    %14 = vector.broadcast %cst_8 : f32 to vector<256x256xf32>
    %15 = arith.addf %14, %13 : vector<256x256xf32>
    %16 = arith.mulf %10, %15 : vector<256x256xf32>
    %c0_9 = arith.constant 0 : index
    %c0_10 = arith.constant 0 : index
    %17 = vector.load %arg8[%c0_9, %c0_10] : memref<256x128xf32, #tpu.memory_space<vmem>>, vector<256x128xf32>
    %c0_11 = arith.constant 0 : index
    %c0_12 = arith.constant 0 : index
    %18 = vector.load %arg5[%c0_11, %c0_12] : memref<256x128xf32, #tpu.memory_space<vmem>>, vector<256x128xf32>
    %cst_13 = arith.constant dense<0.000000e+00> : vector<256x128xf32>
    %19 = tpu.matmul %16, %18, %cst_13 {dimension_numbers = #tpu.dot_dimension_numbers<[1], [0], [0], [1], [0, 0, 1, 1], [], []>} : vector<256x256xf32>, vector<256x128xf32>, vector<256x128xf32> -> vector<256x128xf32>
    %20 = arith.addf %17, %19 : vector<256x128xf32>
    %c0_14 = arith.constant 0 : index
    %c0_15 = arith.constant 0 : index
    %21 = vector.load %arg8[%c0_14, %c0_15] : memref<256x128xf32, #tpu.memory_space<vmem>>, vector<256x128xf32>
    tpu.vector_store %arg8[%c0_14, %c0_15], %20 {strides = array<i32>} : memref<256x128xf32, #tpu.memory_space<vmem>>, vector<256x128xf32>,
    %c0_i32_16 = arith.constant 0 : i32
    %22 = arith.cmpi eq, %arg1, %c0_i32_16 : i32
    %23 = arith.extui %22 : i1 to i32
    %c0_i32_17 = arith.constant 0 : i32
    %24 = arith.cmpi ne, %23, %c0_i32_17 : i32
    scf.if %24 {
      %c0_18 = arith.constant 0 : index
      %c0_19 = arith.constant 0 : index
      %25 = vector.load %arg8[%c0_18, %c0_19] : memref<256x128xf32, #tpu.memory_space<vmem>>, vector<256x128xf32>
      %c0_20 = arith.constant 0 : index
      %c0_21 = arith.constant 0 : index
      %26 = vector.load %arg6[%c0_20, %c0_21] : memref<1x128xf32, #tpu.memory_space<vmem>>, vector<1x128xf32>
      %27 = vector.broadcast %26 : vector<1x128xf32> to vector<256x128xf32>
      %28 = arith.addf %25, %27 : vector<256x128xf32>
      %c0_22 = arith.constant 0 : index
      %c0_23 = arith.constant 0 : index
      %29 = vector.load %arg7[%c0_22, %c0_23] : memref<256x128xf32, #tpu.memory_space<vmem>>, vector<256x128xf32>
      tpu.vector_store %arg7[%c0_22, %c0_23], %28 {strides = array<i32>} : memref<256x128xf32, #tpu.memory_space<vmem>>, vector<256x128xf32>,
    } else {
    }
    return
  }
  func.func @transform_0(%arg0: i32, %arg1: i32) -> (i32, i32) {
    %c0_i32 = arith.constant 0 : i32
    %c0_i32_0 = arith.constant 0 : i32
    return %arg0, %c0_i32 : i32, i32
  }
  func.func @transform_1(%arg0: i32, %arg1: i32) -> (i32, i32) {
    %c0_i32 = arith.constant 0 : i32
    %c0_i32_0 = arith.constant 0 : i32
    return %c0_i32, %arg1 : i32, i32
  }
  func.func @transform_2(%arg0: i32, %arg1: i32) -> (i32, i32) {
    %c0_i32 = arith.constant 0 : i32
    %c0_i32_0 = arith.constant 0 : i32
    return %c0_i32, %arg1 : i32, i32
  }
  func.func @transform_3(%arg0: i32, %arg1: i32) -> (i32, i32) {
    %c0_i32 = arith.constant 0 : i32
    %c0_i32_0 = arith.constant 0 : i32
    return %arg1, %c0_i32 : i32, i32
  }
  func.func @transform_4(%arg0: i32, %arg1: i32) -> (i32, i32) {
    %c0_i32 = arith.constant 0 : i32
    %c0_i32_0 = arith.constant 0 : i32
    %c0_i32_1 = arith.constant 0 : i32
    return %c0_i32, %c0_i32_0 : i32, i32
  }
  func.func @transform_5(%arg0: i32, %arg1: i32) -> (i32, i32) {
    %c0_i32 = arith.constant 0 : i32
    %c0_i32_0 = arith.constant 0 : i32
    return %arg0, %c0_i32 : i32, i32
  }
}

</mosaic_0001>

<bundles_post_ra>
// kernel: mlp_forward.1
= control target key start
LH: loop header
LB: loop body
LE: loop exit
PB: predicated region body
PF: predicated region fallthrough
CT: control target
= control target key end

     0   :  { %10 = vsyncpa [#allocation4], 0  ;;  %s2050_s0 = inlined_call_operand.hbm [shape: f32[256,128], index: 0, kind: input, shape index: {}]   ;;  %s2051_s1 = inlined_call_operand.hbm [shape: f32[128,256], index: 1, kind: input, shape index: {}]   ;;  %s2052_s2 = inlined_call_operand.vmem [shape: f32[1,256], index: 2, kind: input, shape index: {}]   ;;  %s2053_s3 = inlined_call_operand.hbm [shape: f32[256,128], index: 3, kind: input, shape index: {}]   ;;  %s2054_s4 = inlined_call_operand.vmem [shape: f32[1,128], index: 4, kind: input, shape index: {}]   ;;  %s2055_s5 = inlined_call_operand.hbm [shape: f32[256,128], index: 5, kind: output, shape index: {}]  }
   0x1   :  { %11 = vsyncpa [#allocation7], 0 }
   0x2   :  { %12 = vsyncpa [#allocation5], 0  ;;  %s1573_s18 = smov [#allocation6]   ;;  %s1479_s22 = scalar_lea.hbm %s2051_s1, 4096 }
   0x3   :  { %s30_s19 = sshll.u32 %s1573_s18, 4  ;;  %p1480_p0 = scmp.ne.s32.totalorder %s2051_s1, %s1479_s22  ;;  %s31_s19 = int_to_ptr.vmem [resolvable:$true] %s30_s19 }
   0x4   :  { %p1483_p1 = scmp.lt.u32.totalorder %s1479_s22, %s2051_s1 }
   0x6   :  { %p1485_p2 = pnand %p1483_p1, %p1480_p0 }
   0x8   :  { %1488 = shalt.err (!%p1485_p2)
}
   0x9   :  { %s1489_s27 = scalar_lea.vmem %s31_s19, 4096  ;;  %p1494_p4 = scmp.lt.s32.totalorder %s31_s19, %s31_s19 }
   0xa   :  { %p1490_p3 = scmp.ne.s32.totalorder %s31_s19, %s1489_s27  ;;  %p1495_p5 = scmp.lt.s32.totalorder %s1489_s27, %s1489_s27 }
   0xc   :  { %p1496_p6 = por %p1495_p5, %p1494_p4 }
   0xe   :  { %p1497_p7 = pnand %p1496_p6, %p1490_p3 }
  0x10   :  { %1500 = shalt.err (!%p1497_p7)
}
  0x11   :  { %s1574_s28 = smov 256   ;;  %s1575_s29 = smov 16  }
  0x12   :  { %36 = dma.hbm_to_vmem [thread:$0]  %s2051_s1, 4096, %s31_s19, [#allocation7], %s1574_s28, %s1574_s28, %s1575_s29  }
  0x13   :  { %s1576_s7 = smov [#allocation3]   ;;  %s1501_s11 = scalar_lea.hbm %s2050_s0, 4096 }
  0x14   :  { %s18_s8 = sshll.u32 %s1576_s7, 4  ;;  %p1502_p8 = scmp.ne.s32.totalorder %s2050_s0, %s1501_s11  ;;  %s19_s8 = int_to_ptr.vmem [resolvable:$true] %s18_s8 }
  0x15   :  { %p1505_p9 = scmp.lt.u32.totalorder %s1501_s11, %s2050_s0 }
  0x17   :  { %p1507_p10 = pnand %p1505_p9, %p1502_p8 }
  0x19   :  { %1510 = shalt.err (!%p1507_p10)
}
  0x1a   :  { %s1511_s16 = scalar_lea.vmem %s19_s8, 4096  ;;  %p1516_p12 = scmp.lt.s32.totalorder %s19_s8, %s19_s8 }
  0x1b   :  { %p1512_p11 = scmp.ne.s32.totalorder %s19_s8, %s1511_s16  ;;  %p1517_p13 = scmp.lt.s32.totalorder %s1511_s16, %s1511_s16 }
  0x1d   :  { %p1518_p0 = por %p1517_p13, %p1516_p12 }
  0x1f   :  { %p1519_p1 = pnand %p1518_p0, %p1512_p11 }
  0x21   :  { %1522 = shalt.err (!%p1519_p1)
}
  0x22   :  { %s1577_s1 = smov 128   ;;  %s1578_s17 = smov 8  }
  0x23   :  { %24 = dma.hbm_to_vmem [thread:$0]  %s2050_s0, 4096, %s19_s8, [#allocation4], %s1577_s1, %s1577_s1, %s1578_s17  }
  0x24   :  { %s1579_s20 = smov [#allocation8]   ;;  %s1523_s24 = scalar_lea.hbm %s2053_s3, 4096 }
  0x25   :  { %s44_s21 = sshll.u32 %s1579_s20, 4  ;;  %p1524_p2 = scmp.ne.s32.totalorder %s2053_s3, %s1523_s24  ;;  %s45_s21 = int_to_ptr.vmem [resolvable:$true] %s44_s21 }
  0x26   :  { %p1527_p3 = scmp.lt.u32.totalorder %s1523_s24, %s2053_s3 }
  0x28   :  { %p1529_p4 = pnand %p1527_p3, %p1524_p2 }
  0x2a   :  { %1532 = shalt.err (!%p1529_p4)
}
  0x2b   :  { %s1533_s29 = scalar_lea.vmem %s45_s21, 4096  ;;  %p1538_p6 = scmp.lt.s32.totalorder %s45_s21, %s45_s21 }
  0x2c   :  { %p1534_p5 = scmp.ne.s32.totalorder %s45_s21, %s1533_s29  ;;  %p1539_p7 = scmp.lt.s32.totalorder %s1533_s29, %s1533_s29 }
  0x2e   :  { %p1540_p8 = por %p1539_p7, %p1538_p6 }
  0x30   :  { %p1541_p9 = pnand %p1540_p8, %p1534_p5 }
  0x32   :  { %1544 = shalt.err (!%p1541_p9)
}
  0x33   :  { %50 = dma.hbm_to_vmem [thread:$0]  %s2053_s3, 4096, %s45_s21, [#allocation7], %s1577_s1, %s1577_s1, %s1578_s17  }
  0x34   :  { %1567 = dma.done.wait [#allocation4], 4096  }
  0x35   :  { %1568 = vsyncadd [#allocation4], 4294963200 }
  0x36   :  { %1569 = dma.done.wait [#allocation7], 8192  }
  0x37   :  { %1570 = vsyncadd [#allocation7], 4294959104  ;;  %v1580_v0 = vmov 0.0   ;;  %v131_v1 = vld [vmem:[#allocation6 + $0x8] sm:$0xff]  ;;  %v133_v2 = vld [vmem:[#allocation6 + $0x18] sm:$0xff]  ;;  %v1581_v53 = vmov 0.0|0.0  }
  0x38   :  { %238 = vmatprep.mubr.f32.mxu0 %v1580_v0  ;;  %v130_v3 = vld [vmem:[#allocation6] sm:$0xff]  ;;  %v1229_v4 = vpack.c.bf16 %v133_v2, %v131_v1  ;;  %v132_v5 = vld [vmem:[#allocation6 + $0x10] sm:$0xff]  ;;  %v135_v6 = vld [vmem:[#allocation6 + $0x28] sm:$0xff]  ;;  %1309 = vmatprep.subr.bf16.mxu1 %v1581_v53 }
  0x39   :  { %v137_v7 = vld [vmem:[#allocation6 + $0x38] sm:$0xff]  ;;  %v1231_v8 = vpack.c.bf16 %v132_v5, %v130_v3  ;;  %v134_v10 = vld [vmem:[#allocation6 + $0x20] sm:$0xff]  ;;  %v136_v11 = vld [vmem:[#allocation6 + $0x30] sm:$0xff] }
  0x3a   :  { %v1233_v9 = vpack.c.bf16 %v137_v7, %v135_v6  ;;  %v139_v12 = vld [vmem:[#allocation6 + $0x48] sm:$0xff]  ;;  %1230 = vmatprep.subr.bf16.mxu0 %v1229_v4  ;;  %v141_v13 = vld [vmem:[#allocation6 + $0x58] sm:$0xff]  ;;  %v1235_v14 = vpack.c.bf16 %v136_v11, %v134_v10  ;;  %v138_v16 = vld [vmem:[#allocation6 + $0x40] sm:$0xff] }
  0x3b   :  { %1232 = vmatpush1.bf16.msra.mxu0 %v1231_v8  ;;  %v1237_v15 = vpack.c.bf16 %v141_v13, %v139_v12  ;;  %v140_v17 = vld [vmem:[#allocation6 + $0x50] sm:$0xff]  ;;  %v143_v18 = vld [vmem:[#allocation6 + $0x68] sm:$0xff]  ;;  %v145_v19 = vld [vmem:[#allocation6 + $0x78] sm:$0xff] }
  0x3c   :  { %1234 = vmatprep.subr.bf16.mxu0 %v1233_v9  ;;  %v1239_v20 = vpack.c.bf16 %v140_v17, %v138_v16  ;;  %v1241_v21 = vpack.c.bf16 %v145_v19, %v143_v18  ;;  %v142_v22 = vld [vmem:[#allocation6 + $0x60] sm:$0xff]  ;;  %v144_v23 = vld [vmem:[#allocation6 + $0x70] sm:$0xff]  ;;  %v147_v24 = vld [vmem:[#allocation6 + $0x88] sm:$0xff] }
  0x3d   :  { %v149_v25 = vld [vmem:[#allocation6 + $0x98] sm:$0xff]  ;;  %v1243_v26 = vpack.c.bf16 %v144_v23, %v142_v22  ;;  %v146_v28 = vld [vmem:[#allocation6 + $0x80] sm:$0xff]  ;;  %v148_v29 = vld [vmem:[#allocation6 + $0x90] sm:$0xff] }
  0x3e   :  { %v1245_v27 = vpack.c.bf16 %v149_v25, %v147_v24  ;;  %v151_v30 = vld [vmem:[#allocation6 + $0xa8] sm:$0xff]  ;;  %v153_v31 = vld [vmem:[#allocation6 + $0xb8] sm:$0xff]  ;;  %v1247_v32 = vpack.c.bf16 %v148_v29, %v146_v28  ;;  %v150_v34 = vld [vmem:[#allocation6 + $0xa0] sm:$0xff] }
  0x3f   :  { %1236 = vmatpush1.bf16.msra.mxu0 %v1235_v14  ;;  %v1249_v33 = vpack.c.bf16 %v153_v31, %v151_v30  ;;  %v152_v35 = vld [vmem:[#allocation6 + $0xb0] sm:$0xff]  ;;  %v155_v36 = vld [vmem:[#allocation6 + $0xc8] sm:$0xff]  ;;  %v157_v37 = vld [vmem:[#allocation6 + $0xd8] sm:$0xff] }
  0x40   :  { %1238 = vmatprep.subr.bf16.mxu0 %v1237_v15  ;;  %v1251_v38 = vpack.c.bf16 %v152_v35, %v150_v34  ;;  %v1253_v39 = vpack.c.bf16 %v157_v37, %v155_v36  ;;  %v154_v40 = vld [vmem:[#allocation6 + $0xc0] sm:$0xff]  ;;  %v156_v41 = vld [vmem:[#allocation6 + $0xd0] sm:$0xff]  ;;  %v159_v42 = vld [vmem:[#allocation6 + $0xe8] sm:$0xff] }
  0x41   :  { %v161_v43 = vld [vmem:[#allocation6 + $0xf8] sm:$0xff]  ;;  %v1255_v44 = vpack.c.bf16 %v156_v41, %v154_v40  ;;  %v158_v46 = vld [vmem:[#allocation6 + $0xe0] sm:$0xff]  ;;  %v160_v47 = vld [vmem:[#allocation6 + $0xf0] sm:$0xff] }
  0x42   :  { %v1257_v45 = vpack.c.bf16 %v161_v43, %v159_v42  ;;  %v1259_v48 = vpack.c.bf16 %v160_v47, %v158_v46  ;;  %v783_v49 = vld [vmem:[#allocation8] sm:$0xff]  ;;  %v784_v50 = vld [vmem:[#allocation8 + $0x8] sm:$0xff]  ;;  %v785_v54 = vld [vmem:[#allocation8 + $0x10] sm:$0xff] }
  0x43   :  { %1240 = vmatpush1.bf16.msra.mxu0 %v1239_v20  ;;  %v98_v51 = vld [vmem:[#allocation3] sm:$0xff]  ;;  %v1262_v52 = vpack.c.bf16 %v784_v50, %v783_v49  ;;  %v786_v55 = vld [vmem:[#allocation8 + $0x18] sm:$0xff]  ;;  %v99_v56 = vld [vmem:[#allocation3 + $0x8] sm:$0xff] }
  0x44   :  { %1242 = vmatprep.subr.bf16.mxu0 %v1241_v21  ;;  %v1265_v57 = vpack.c.bf16 %v786_v55, %v785_v54  ;;  %v787_v58 = vld [vmem:[#allocation8 + $0x20] sm:$0xff]  ;;  %v788_v59 = vld [vmem:[#allocation8 + $0x28] sm:$0xff]  ;;  %v100_v60 = vld [vmem:[#allocation3 + $0x10] sm:$0xff] }
  0x45   :  { %1325 = vmatpush1.bf16.msra.mxu1 %v1262_v52  ;;  %v1268_v61 = vpack.c.bf16 %v788_v59, %v787_v58  ;;  %v789_v62 = vld [vmem:[#allocation8 + $0x30] sm:$0xff]  ;;  %v790_v63 = vld [vmem:[#allocation8 + $0x38] sm:$0xff]  ;;  %v791_v3 = vld [vmem:[#allocation8 + $0x40] sm:$0xff] }
  0x46   :  { %1310 = vmatprep.subr.bf16.mxu1 %v1581_v53  ;;  %v101_v1 = vld [vmem:[#allocation3 + $0x18] sm:$0xff]  ;;  %v1271_v2 = vpack.c.bf16 %v790_v63, %v789_v62  ;;  %v792_v4 = vld [vmem:[#allocation8 + $0x48] sm:$0xff]  ;;  %v102_v5 = vld [vmem:[#allocation3 + $0x20] sm:$0xff] }
  0x47   :  { %1244 = vmatpush1.bf16.msra.mxu0 %v1243_v26  ;;  %v1274_v6 = vpack.c.bf16 %v792_v4, %v791_v3  ;;  %v793_v7 = vld [vmem:[#allocation8 + $0x50] sm:$0xff]  ;;  %v794_v8 = vld [vmem:[#allocation8 + $0x58] sm:$0xff]  ;;  %v103_v9 = vld [vmem:[#allocation3 + $0x28] sm:$0xff]  ;;  %v164_v4 = vlaneseq }
  0x48   :  { %1246 = vmatprep.subr.bf16.mxu0 %v1245_v27  ;;  %v1277_v10 = vpack.c.bf16 %v794_v8, %v793_v7  ;;  %v795_v11 = vld [vmem:[#allocation8 + $0x60] sm:$0xff]  ;;  %v796_v12 = vld [vmem:[#allocation8 + $0x68] sm:$0xff]  ;;  %v104_v13 = vld [vmem:[#allocation3 + $0x30] sm:$0xff] }
  0x49   :  { %1326 = vmatpush1.bf16.msra.mxu1 %v1265_v57  ;;  %v1280_v14 = vpack.c.bf16 %v796_v12, %v795_v11  ;;  %v797_v15 = vld [vmem:[#allocation8 + $0x70] sm:$0xff]  ;;  %v798_v16 = vld [vmem:[#allocation8 + $0x78] sm:$0xff]  ;;  %v799_v19 = vld [vmem:[#allocation8 + $0x80] sm:$0xff] }
  0x4a   :  { %1311 = vmatprep.subr.bf16.mxu1 %v1581_v53  ;;  %v105_v17 = vld [vmem:[#allocation3 + $0x38] sm:$0xff]  ;;  %v1283_v18 = vpack.c.bf16 %v798_v16, %v797_v15  ;;  %v800_v20 = vld [vmem:[#allocation8 + $0x88] sm:$0xff]  ;;  %v106_v21 = vld [vmem:[#allocation3 + $0x40] sm:$0xff] }
  0x4b   :  { %1248 = vmatpush1.bf16.msra.mxu0 %v1247_v32  ;;  %v1286_v22 = vpack.c.bf16 %v800_v20, %v799_v19  ;;  %v801_v23 = vld [vmem:[#allocation8 + $0x90] sm:$0xff]  ;;  %v802_v24 = vld [vmem:[#allocation8 + $0x98] sm:$0xff]  ;;  %v107_v25 = vld [vmem:[#allocation3 + $0x48] sm:$0xff] }
  0x4c   :  { %1250 = vmatprep.subr.bf16.mxu0 %v1249_v33  ;;  %v1289_v26 = vpack.c.bf16 %v802_v24, %v801_v23  ;;  %v803_v27 = vld [vmem:[#allocation8 + $0xa0] sm:$0xff]  ;;  %v804_v28 = vld [vmem:[#allocation8 + $0xa8] sm:$0xff]  ;;  %v108_v29 = vld [vmem:[#allocation3 + $0x50] sm:$0xff] }
  0x4d   :  { %1327 = vmatpush1.bf16.msra.mxu1 %v1268_v61  ;;  %v1292_v30 = vpack.c.bf16 %v804_v28, %v803_v27  ;;  %v109_v31 = vld [vmem:[#allocation3 + $0x58] sm:$0xff]  ;;  %v110_v32 = vld [vmem:[#allocation3 + $0x60] sm:$0xff]  ;;  %v111_v33 = vld [vmem:[#allocation3 + $0x68] sm:$0xff] }
  0x4e   :  { %1312 = vmatprep.subr.bf16.mxu1 %v1581_v53  ;;  %v112_v34 = vld [vmem:[#allocation3 + $0x70] sm:$0xff]  ;;  %v113_v35 = vld [vmem:[#allocation3 + $0x78] sm:$0xff]  ;;  %v114_v36 = vld [vmem:[#allocation3 + $0x80] sm:$0xff] }
  0x4f   :  { %1252 = vmatpush1.bf16.msra.mxu0 %v1251_v38  ;;  %v115_v37 = vld [vmem:[#allocation3 + $0x88] sm:$0xff]  ;;  %v116_v38 = vld [vmem:[#allocation3 + $0x90] sm:$0xff]  ;;  %v118_v40 = vld [vmem:[#allocation3 + $0xa0] sm:$0xff] }
  0x50   :  { %1254 = vmatprep.subr.bf16.mxu0 %v1253_v39  ;;  %v117_v39 = vld [vmem:[#allocation3 + $0x98] sm:$0xff]  ;;  %v119_v41 = vld [vmem:[#allocation3 + $0xa8] sm:$0xff]  ;;  %v805_v42 = vld [vmem:[#allocation8 + $0xb0] sm:$0xff] }
  0x51   :  { %1328 = vmatpush1.bf16.msra.mxu1 %v1271_v2  ;;  %v806_v43 = vld [vmem:[#allocation8 + $0xb8] sm:$0xff]  ;;  %v807_v46 = vld [vmem:[#allocation8 + $0xc0] sm:$0xff]  ;;  %v808_v47 = vld [vmem:[#allocation8 + $0xc8] sm:$0xff] }
  0x52   :  { %1313 = vmatprep.subr.bf16.mxu1 %v1581_v53  ;;  %v121_v49 = vld [vmem:[#allocation3 + $0xb8] sm:$0xff]  ;;  %v809_v50 = vld [vmem:[#allocation8 + $0xd0] sm:$0xff]  ;;  %v122_v54 = vld [vmem:[#allocation3 + $0xc0] sm:$0xff] }
  0x53   :  { %1256 = vmatpush1.bf16.msra.mxu0 %v1255_v44  ;;  %v1295_v44 = vpack.c.bf16 %v806_v43, %v805_v42  ;;  %v811_v55 = vld [vmem:[#allocation8 + $0xe0] sm:$0xff]  ;;  %v123_v58 = vld [vmem:[#allocation3 + $0xc8] sm:$0xff]  ;;  %v813_v59 = vld [vmem:[#allocation8 + $0xf0] sm:$0xff] }
  0x54   :  { %1258 = vmatprep.subr.bf16.mxu0 %v1257_v45  ;;  %v120_v45 = vld [vmem:[#allocation3 + $0xb0] sm:$0xff]  ;;  %v125_v63 = vld [vmem:[#allocation3 + $0xd8] sm:$0xff]  ;;  %v162_v7 = vld [vmem:[%s2052_s2] sm:$0x3] }
  0x55   :  { %1329 = vmatpush1.bf16.msra.mxu1 %v1274_v6  ;;  %v124_v62 = vld [vmem:[#allocation3 + $0xd0] sm:$0xff]  ;;  %v129_v3 = vld [vmem:[#allocation3 + $0xf8] sm:$0xff] }
  0x56   :  { %1314 = vmatprep.subr.bf16.mxu1 %v1581_v53 }
  0x57   :  { %1260 = vmatpush1.bf16.msra.mxu0 %v1259_v48  ;;  %v1298_v48 = vpack.c.bf16 %v808_v47, %v807_v46 }
  0x58   :  { %1261 = vmatprep.subr.bf16.mxu0 %v1581_v53 }
  0x59   :  { %1330 = vmatpush1.bf16.msra.mxu1 %v1277_v10 }
  0x5a   :  { %239 = vmatmul.mubr.f32.vlgmr.msra.gmra.mrb[0].mxu0 %v98_v51  ;;  %1315 = vmatprep.subr.bf16.mxu1 %v1581_v53  ;;  %v810_v51 = vld [vmem:[#allocation8 + $0xd8] sm:$0xff] }
  0x5b   :  { %244 = vmatprep.mubr.f32.mxu0 %v1580_v0  ;;  %1263 = vmatpush1.bf16.msra.mxu0 %v1262_v52  ;;  %v1301_v52 = vpack.c.bf16 %v810_v51, %v809_v50 }
  0x5c   :  { %1264 = vmatprep.subr.bf16.mxu0 %v1581_v53 }
  0x5d   :  { %1331 = vmatpush1.bf16.msra.mxu1 %v1280_v14 }
  0x5e   :  { %245 = vmatmul.mubr.f32.gmra.mrb[2].mxu0 %v99_v56  ;;  %1316 = vmatprep.subr.bf16.mxu1 %v1581_v53  ;;  %v812_v56 = vld [vmem:[#allocation8 + $0xe8] sm:$0xff] }
  0x5f   :  { %250 = vmatprep.mubr.f32.mxu0 %v1580_v0  ;;  %1266 = vmatpush1.bf16.msra.mxu0 %v1265_v57  ;;  %v1304_v57 = vpack.c.bf16 %v812_v56, %v811_v55 }
  0x60   :  { %1267 = vmatprep.subr.bf16.mxu0 %v1581_v53 }
  0x61   :  { %1332 = vmatpush1.bf16.msra.mxu1 %v1283_v18 }
  0x62   :  { %251 = vmatmul.mubr.f32.gmra.mrb[4].mxu0 %v100_v60  ;;  %1317 = vmatprep.subr.bf16.mxu1 %v1581_v53  ;;  %v814_v60 = vld [vmem:[#allocation8 + $0xf8] sm:$0xff] }
  0x63   :  { %256 = vmatprep.mubr.f32.mxu0 %v1580_v0  ;;  %1269 = vmatpush1.bf16.msra.mxu0 %v1268_v61  ;;  %v1307_v61 = vpack.c.bf16 %v814_v60, %v813_v59 }
  0x64   :  { %1270 = vmatprep.subr.bf16.mxu0 %v1581_v53 }
  0x65   :  { %1333 = vmatpush1.bf16.msra.mxu1 %v1286_v22 }
  0x66   :  { %257 = vmatmul.mubr.f32.gmra.mrb[6].mxu0 %v101_v1  ;;  %1318 = vmatprep.subr.bf16.mxu1 %v1581_v53  ;;  %v126_v1 = vld [vmem:[#allocation3 + $0xe0] sm:$0xff] }
  0x67   :  { %262 = vmatprep.mubr.f32.mxu0 %v1580_v0  ;;  %1272 = vmatpush1.bf16.msra.mxu0 %v1271_v2  ;;  %v127_v2 = vld [vmem:[#allocation3 + $0xe8] sm:$0xff] }
  0x68   :  { %1273 = vmatprep.subr.bf16.mxu0 %v1581_v53 }
  0x69   :  { %1334 = vmatpush1.bf16.msra.mxu1 %v1289_v26 }
  0x6a   :  { %263 = vmatmul.mubr.f32.gmra.mrb[8].mxu0 %v102_v5  ;;  %1319 = vmatprep.subr.bf16.mxu1 %v1581_v53  ;;  %v165_v5 = vshrl.u32 %v164_v4, 7 }
  0x6b   :  { %268 = vmatprep.mubr.f32.mxu0 %v1580_v0  ;;  %1275 = vmatpush1.bf16.msra.mxu0 %v1274_v6 }
  0x6c   :  { %1276 = vmatprep.subr.bf16.mxu0 %v1581_v53  ;;  %v166_v6 = vsub.s32 0, %v165_v5  ;;  %v170_v8 = vsub.s32 1, %v165_v5 }
  0x6d   :  { %1335 = vmatpush1.bf16.msra.mxu1 %v1292_v30 }
  0x6e   :  { %269 = vmatmul.mubr.f32.gmra.mrb[10].mxu0 %v103_v9  ;;  %1320 = vmatprep.subr.bf16.mxu1 %v1581_v53  ;;  %v1722_v9 = vrot.slane %v162_v7, %v166_v6 }
  0x6f   :  { %274 = vmatprep.mubr.f32.mxu0 %v1580_v0  ;;  %1278 = vmatpush1.bf16.msra.mxu0 %v1277_v10  ;;  %v1724_v10 = vrot.slane %v162_v7, %v170_v8 }
  0x70   :  { %1279 = vmatprep.subr.bf16.mxu0 %v1581_v53 }
  0x71   :  { %1336 = vmatpush1.bf16.msra.mxu1 %v1295_v44 }
  0x72   :  { %275 = vmatmul.mubr.f32.gmra.mrb[12].mxu0 %v104_v13  ;;  %1321 = vmatprep.subr.bf16.mxu1 %v1581_v53 }
  0x73   :  { %280 = vmatprep.mubr.f32.mxu0 %v1580_v0  ;;  %1281 = vmatpush1.bf16.msra.mxu0 %v1280_v14 }
  0x74   :  { %1282 = vmatprep.subr.bf16.mxu0 %v1581_v53 }
  0x75   :  { %1337 = vmatpush1.bf16.msra.mxu1 %v1298_v48 }
  0x76   :  { %281 = vmatmul.mubr.f32.gmra.mrb[14].mxu0 %v105_v17  ;;  %1322 = vmatprep.subr.bf16.mxu1 %v1581_v53 }
  0x77   :  { %286 = vmatprep.mubr.f32.mxu0 %v1580_v0  ;;  %1284 = vmatpush1.bf16.msra.mxu0 %v1283_v18 }
  0x78   :  { %1285 = vmatprep.subr.bf16.mxu0 %v1581_v53 }
  0x79   :  { %1338 = vmatpush1.bf16.msra.mxu1 %v1301_v52 }
  0x7a   :  { %287 = vmatmul.mubr.f32.gmra.mrb[16].mxu0 %v106_v21  ;;  %1323 = vmatprep.subr.bf16.mxu1 %v1581_v53 }
  0x7b   :  { %292 = vmatprep.mubr.f32.mxu0 %v1580_v0  ;;  %1287 = vmatpush1.bf16.msra.mxu0 %v1286_v22 }
  0x7c   :  { %1288 = vmatprep.subr.bf16.mxu0 %v1581_v53 }
  0x7d   :  { %1339 = vmatpush1.bf16.msra.mxu1 %v1304_v57 }
  0x7e   :  { %293 = vmatmul.mubr.f32.gmra.mrb[18].mxu0 %v107_v25  ;;  %1324 = vmatprep.subr.bf16.mxu1 %v1581_v53 }
  0x7f   :  { %298 = vmatprep.mubr.f32.mxu0 %v1580_v0  ;;  %1290 = vmatpush1.bf16.msra.mxu0 %v1289_v26 }
  0x80   :  { %1291 = vmatprep.subr.bf16.mxu0 %v1581_v53 }
  0x81   :  { %1340 = vmatpush1.bf16.msra.mxu1 %v1307_v61 }
  0x82   :  { %299 = vmatmul.mubr.f32.gmra.mrb[20].mxu0 %v108_v29 }
  0x83   :  { %304 = vmatprep.mubr.f32.mxu0 %v1580_v0  ;;  %1293 = vmatpush1.bf16.msra.mxu0 %v1292_v30 }
  0x84   :  { %1294 = vmatprep.subr.bf16.mxu0 %v1581_v53 }
  0x86   :  { %305 = vmatmul.mubr.f32.gmra.mrb[22].mxu0 %v109_v31 }
  0x87   :  { %310 = vmatprep.mubr.f32.mxu0 %v1580_v0  ;;  %1296 = vmatpush1.bf16.msra.mxu0 %v1295_v44 }
  0x88   :  { %1297 = vmatprep.subr.bf16.mxu0 %v1581_v53 }
  0x8a   :  { %311 = vmatmul.mubr.f32.gmra.mrb[24].mxu0 %v110_v32 }
  0x8b   :  { %316 = vmatprep.mubr.f32.mxu0 %v1580_v0  ;;  %1299 = vmatpush1.bf16.msra.mxu0 %v1298_v48 }
  0x8c   :  { %1300 = vmatprep.subr.bf16.mxu0 %v1581_v53 }
  0x8e   :  { %317 = vmatmul.mubr.f32.gmra.mrb[26].mxu0 %v111_v33 }
  0x8f   :  { %322 = vmatprep.mubr.f32.mxu0 %v1580_v0  ;;  %1302 = vmatpush1.bf16.msra.mxu0 %v1301_v52 }
  0x90   :  { %1303 = vmatprep.subr.bf16.mxu0 %v1581_v53 }
  0x92   :  { %323 = vmatmul.mubr.f32.gmra.mrb[28].mxu0 %v112_v34 }
  0x93   :  { %328 = vmatprep.mubr.f32.mxu0 %v1580_v0  ;;  %1305 = vmatpush1.bf16.msra.mxu0 %v1304_v57 }
  0x94   :  { %1306 = vmatprep.subr.bf16.mxu0 %v1581_v53  ;;  %v128_v53 = vld [vmem:[#allocation3 + $0xf0] sm:$0xff] }
  0x96   :  { %329 = vmatmul.mubr.f32.gmra.mrb[30].mxu0 %v113_v35 }
  0x97   :  { %334 = vmatprep.mubr.f32.mxu0 %v1580_v0  ;;  %1308 = vmatpush1.bf16.msra.mxu0 %v1307_v61 }
  0x9a   :  { %335 = vmatmul.mubr.f32.gmra.mrb[32].mxu0 %v114_v36 }
  0x9b   :  { %340 = vmatprep.mubr.f32.mxu0 %v1580_v0 }
  0x9e   :  { %341 = vmatmul.mubr.f32.gmra.mrb[34].mxu0 %v115_v37 }
  0x9f   :  { %346 = vmatprep.mubr.f32.mxu0 %v1580_v0 }
  0xa2   :  { %347 = vmatmul.mubr.f32.gmra.mrb[36].mxu0 %v116_v38 }
  0xa3   :  { %352 = vmatprep.mubr.f32.mxu0 %v1580_v0 }
  0xa6   :  { %353 = vmatmul.mubr.f32.gmra.mrb[38].mxu0 %v117_v39 }
  0xa7   :  { %358 = vmatprep.mubr.f32.mxu0 %v1580_v0 }
  0xaa   :  { %359 = vmatmul.mubr.f32.gmra.mrb[40].mxu0 %v118_v40 }
  0xab   :  { %364 = vmatprep.mubr.f32.mxu0 %v1580_v0 }
  0xae   :  { %365 = vmatmul.mubr.f32.gmra.mrb[42].mxu0 %v119_v41 }
  0xaf   :  { %370 = vmatprep.mubr.f32.mxu0 %v1580_v0 }
  0xb2   :  { %371 = vmatmul.mubr.f32.gmra.mrb[44].mxu0 %v120_v45 }
  0xb3   :  { %376 = vmatprep.mubr.f32.mxu0 %v1580_v0 }
  0xb6   :  { %377 = vmatmul.mubr.f32.gmra.mrb[46].mxu0 %v121_v49 }
  0xb7   :  { %382 = vmatprep.mubr.f32.mxu0 %v1580_v0 }
  0xba   :  { %383 = vmatmul.mubr.f32.gmra.mrb[48].mxu0 %v122_v54 }
  0xbb   :  { %388 = vmatprep.mubr.f32.mxu0 %v1580_v0 }
  0xbe   :  { %389 = vmatmul.mubr.f32.gmra.mrb[50].mxu0 %v123_v58 }
  0xbf   :  { %394 = vmatprep.mubr.f32.mxu0 %v1580_v0 }
  0xc2   :  { %395 = vmatmul.mubr.f32.gmra.mrb[52].mxu0 %v124_v62 }
  0xc3   :  { %400 = vmatprep.mubr.f32.mxu0 %v1580_v0 }
  0xc6   :  { %401 = vmatmul.mubr.f32.gmra.mrb[54].mxu0 %v125_v63 }
  0xc7   :  { %406 = vmatprep.mubr.f32.mxu0 %v1580_v0 }
  0xca   :  { %407 = vmatmul.mubr.f32.gmra.mrb[56].mxu0 %v126_v1 }
  0xcb   :  { %412 = vmatprep.mubr.f32.mxu0 %v1580_v0 }
  0xce   :  { %413 = vmatmul.mubr.f32.gmra.mrb[58].mxu0 %v127_v2 }
  0xcf   :  { %418 = vmatprep.mubr.f32.mxu0 %v1580_v0 }
  0xd2   :  { %419 = vmatmul.mubr.f32.gmra.mrb[60].mxu0 %v128_v53 }
  0xd3   :  { %424 = vmatprep.mubr.f32.mxu0 %v1580_v0 }
  0xd6   :  { %425 = vmatmul.mubr.f32.gmra.mrb[62].mxu0 %v129_v3 }
 0x12d   :  { %v240_v11 = vpop.f32.mrb[0].mxu0 }
 0x12e   :  { %v241_v12 = vadd.f32 %v240_v11, %v1722_v9  ;;  %v242_v13 = vpop.f32.mrb[1].mxu0 }
 0x12f   :  { %v243_v0 = vadd.f32 %v242_v13, %v1724_v10 }
 0x130   :  { %v495_v14 = vmul.f32 0.70710677, %v241_v12  ;;  %v431_v42 = vmul.f32 0.5, %v241_v12 }
 0x131   :  { %v496_v15 = vmul.f32 0.70710677, %v243_v0  ;;  %v246_v16 = vpop.f32.mrb[2].mxu0  ;;  %v432_v38 = vmul.f32 0.5, %v243_v0 }
 0x132   :  { %1351 = verf.f32 %v495_v14  ;;  %v247_v17 = vadd.f32 %v246_v16, %v1722_v9  ;;  %v248_v18 = vpop.f32.mrb[3].mxu0 }
 0x133   :  { %1353 = verf.f32 %v496_v15  ;;  %v249_v19 = vadd.f32 %v248_v18, %v1724_v10 }
 0x134   :  { %v497_v20 = vmul.f32 0.70710677, %v247_v17  ;;  %v433_v57 = vmul.f32 0.5, %v247_v17 }
 0x135   :  { %v498_v21 = vmul.f32 0.70710677, %v249_v19  ;;  %v252_v22 = vpop.f32.mrb[4].mxu0  ;;  %v434_v52 = vmul.f32 0.5, %v249_v19 }
 0x136   :  { %1355 = verf.f32 %v497_v20  ;;  %v253_v23 = vadd.f32 %v252_v22, %v1722_v9  ;;  %v254_v24 = vpop.f32.mrb[5].mxu0 }
 0x137   :  { %1357 = verf.f32 %v498_v21  ;;  %v255_v25 = vadd.f32 %v254_v24, %v1724_v10 }
 0x138   :  { %v499_v26 = vmul.f32 0.70710677, %v253_v23  ;;  %v435_v7 = vmul.f32 0.5, %v253_v23 }
 0x139   :  { %v500_v27 = vmul.f32 0.70710677, %v255_v25  ;;  %v258_v28 = vpop.f32.mrb[6].mxu0  ;;  %v436_v3 = vmul.f32 0.5, %v255_v25 }
 0x13a   :  { %1359 = verf.f32 %v499_v26  ;;  %v1733_v29 = vadd.f32 %v258_v28, %v1722_v9  ;;  %v260_v30 = vpop.f32.mrb[7].mxu0 }
 0x13b   :  { %1361 = verf.f32 %v500_v27  ;;  %v261_v31 = vadd.f32 %v260_v30, %v1724_v10 }
 0x13c   :  { %v1352_v32 = vpop.eup %1351  ;;  %v501_v33 = vmul.f32 0.70710677, %v1733_v29  ;;  %v437_v22 = vmul.f32 0.5, %v1733_v29 }
 0x13d   :  { %v1354_v34 = vpop.eup %1353  ;;  %v623_v35 = vadd.f32 1.0, %v1352_v32  ;;  %v502_v36 = vmul.f32 0.70710677, %v261_v31  ;;  %v264_v37 = vpop.f32.mrb[8].mxu0  ;;  %v438_v18 = vmul.f32 0.5, %v261_v31 }
 0x13e   :  { %v624_v39 = vadd.f32 1.0, %v1354_v34  ;;  %1363 = verf.f32 %v501_v33  ;;  %v1738_v40 = vadd.f32 %v264_v37, %v1722_v9  ;;  %v266_v41 = vpop.f32.mrb[9].mxu0 }
 0x13f   :  { %1365 = verf.f32 %v502_v36  ;;  %v1741_v43 = vadd.f32 %v266_v41, %v1724_v10  ;;  %v687_v48 = vmul.f32 %v623_v35, %v431_v42 }
 0x140   :  { %v1356_v44 = vpop.eup %1355  ;;  %v503_v45 = vmul.f32 0.70710677, %v1738_v40  ;;  %v688_v46 = vmul.f32 %v624_v39, %v432_v38  ;;  %v439_v36 = vmul.f32 0.5, %v1738_v40 }
 0x141   :  { %v1358_v47 = vpop.eup %1357  ;;  %v625_v49 = vadd.f32 1.0, %v1356_v44  ;;  %v504_v50 = vmul.f32 0.70710677, %v1741_v43  ;;  %v270_v51 = vpop.f32.mrb[10].mxu0  ;;  %v440_v34 = vmul.f32 0.5, %v1741_v43 }
 0x142   :  { %v626_v54 = vadd.f32 1.0, %v1358_v47  ;;  %1367 = verf.f32 %v503_v45  ;;  %v1746_v55 = vadd.f32 %v270_v51, %v1722_v9  ;;  %v272_v56 = vpop.f32.mrb[11].mxu0  ;;  %879 = vmatprep.mubr.f32.mxu0 %v688_v46 }
 0x143   :  { %1369 = verf.f32 %v504_v50  ;;  %v1749_v58 = vadd.f32 %v272_v56, %v1724_v10  ;;  %880 = vmatmul.mubr.f32.vlgmr.msra.gmra.mrb[64].mxu0 %v687_v48  ;;  %v689_v53 = vmul.f32 %v625_v49, %v433_v57 }
 0x144   :  { %v1360_v59 = vpop.eup %1359  ;;  %v505_v60 = vmul.f32 0.70710677, %v1746_v55  ;;  %v690_v61 = vmul.f32 %v626_v54, %v434_v52  ;;  %v441_v50 = vmul.f32 0.5, %v1746_v55 }
 0x145   :  { %v1362_v62 = vpop.eup %1361  ;;  %v627_v63 = vadd.f32 1.0, %v1360_v59  ;;  %v506_v1 = vmul.f32 0.70710677, %v1749_v58  ;;  %v276_v2 = vpop.f32.mrb[12].mxu0  ;;  %v442_v43 = vmul.f32 0.5, %v1749_v58 }
 0x146   :  { %v628_v4 = vadd.f32 1.0, %v1362_v62  ;;  %1371 = verf.f32 %v505_v60  ;;  %v1754_v5 = vadd.f32 %v276_v2, %v1722_v9  ;;  %v278_v6 = vpop.f32.mrb[13].mxu0  ;;  %884 = vmatprep.mubr.f32.mxu0 %v690_v61 }
 0x147   :  { %1373 = verf.f32 %v506_v1  ;;  %v1757_v8 = vadd.f32 %v278_v6, %v1724_v10  ;;  %885 = vmatmul.mubr.f32.gmra.mrb[66].mxu0 %v689_v53  ;;  %v691_v17 = vmul.f32 %v627_v63, %v435_v7 }
 0x148   :  { %v1364_v11 = vpop.eup %1363  ;;  %v507_v12 = vmul.f32 0.70710677, %v1754_v5  ;;  %v692_v13 = vmul.f32 %v628_v4, %v436_v3  ;;  %v443_v2 = vmul.f32 0.5, %v1754_v5 }
 0x149   :  { %v1366_v0 = vpop.eup %1365  ;;  %v629_v14 = vadd.f32 1.0, %v1364_v11  ;;  %v508_v15 = vmul.f32 0.70710677, %v1757_v8  ;;  %v282_v16 = vpop.f32.mrb[14].mxu0  ;;  %v444_v62 = vmul.f32 0.5, %v1757_v8 }
 0x14a   :  { %v630_v19 = vadd.f32 1.0, %v1366_v0  ;;  %1375 = verf.f32 %v507_v12  ;;  %v1762_v20 = vadd.f32 %v282_v16, %v1722_v9  ;;  %v284_v21 = vpop.f32.mrb[15].mxu0  ;;  %889 = vmatprep.mubr.f32.mxu0 %v692_v13 }
 0x14b   :  { %1377 = verf.f32 %v508_v15  ;;  %v1766_v23 = vadd.f32 %v284_v21, %v1724_v10  ;;  %890 = vmatmul.mubr.f32.gmra.mrb[68].mxu0 %v691_v17  ;;  %v693_v32 = vmul.f32 %v629_v14, %v437_v22 }
 0x14c   :  { %v1368_v24 = vpop.eup %1367  ;;  %v509_v25 = vmul.f32 0.70710677, %v1762_v20  ;;  %v694_v26 = vmul.f32 %v630_v19, %v438_v18  ;;  %v445_v16 = vmul.f32 0.5, %v1762_v20 }
 0x14d   :  { %v1370_v27 = vpop.eup %1369  ;;  %v631_v28 = vadd.f32 1.0, %v1368_v24  ;;  %v510_v30 = vmul.f32 0.70710677, %v1766_v23  ;;  %v288_v31 = vpop.f32.mrb[16].mxu0  ;;  %v446_v0 = vmul.f32 0.5, %v1766_v23 }
 0x14e   :  { %1379 = verf.f32 %v509_v25  ;;  %v1771_v33 = vadd.f32 %v288_v31, %v1722_v9  ;;  %v290_v29 = vpop.f32.mrb[17].mxu0  ;;  %894 = vmatprep.mubr.f32.mxu0 %v694_v26  ;;  %v632_v35 = vadd.f32 1.0, %v1370_v27 }
 0x14f   :  { %1381 = verf.f32 %v510_v30  ;;  %v1776_v37 = vadd.f32 %v290_v29, %v1724_v10  ;;  %895 = vmatmul.mubr.f32.gmra.mrb[70].mxu0 %v693_v32  ;;  %v695_v47 = vmul.f32 %v631_v28, %v439_v36 }
 0x150   :  { %v1372_v38 = vpop.eup %1371  ;;  %v511_v39 = vmul.f32 0.70710677, %v1771_v33  ;;  %v696_v41 = vmul.f32 %v632_v35, %v440_v34  ;;  %v447_v31 = vmul.f32 0.5, %v1771_v33 }
 0x151   :  { %v1374_v42 = vpop.eup %1373  ;;  %v633_v44 = vadd.f32 1.0, %v1372_v38  ;;  %v512_v45 = vmul.f32 0.70710677, %v1776_v37  ;;  %v294_v46 = vpop.f32.mrb[18].mxu0  ;;  %v448_v27 = vmul.f32 0.5, %v1776_v37 }
 0x152   :  { %v634_v48 = vadd.f32 1.0, %v1374_v42  ;;  %1383 = verf.f32 %v511_v39  ;;  %v1782_v40 = vadd.f32 %v294_v46, %v1722_v9  ;;  %v296_v49 = vpop.f32.mrb[19].mxu0  ;;  %899 = vmatprep.mubr.f32.mxu1 %v696_v41 }
 0x153   :  { %1385 = verf.f32 %v512_v45  ;;  %v1786_v51 = vadd.f32 %v296_v49, %v1724_v10  ;;  %900 = vmatmul.mubr.f32.vlgmr.msra.gmra.mrb[0].mxu1 %v695_v47  ;;  %v697_v61 = vmul.f32 %v633_v44, %v441_v50 }
 0x154   :  { %v1376_v52 = vpop.eup %1375  ;;  %v513_v54 = vmul.f32 0.70710677, %v1782_v40  ;;  %v698_v56 = vmul.f32 %v634_v48, %v442_v43  ;;  %v449_v46 = vmul.f32 0.5, %v1782_v40 }
 0x155   :  { %v1378_v57 = vpop.eup %1377  ;;  %v635_v58 = vadd.f32 1.0, %v1376_v52  ;;  %v514_v59 = vmul.f32 0.70710677, %v1786_v51  ;;  %v300_v60 = vpop.f32.mrb[20].mxu0  ;;  %v450_v42 = vmul.f32 0.5, %v1786_v51 }
 0x156   :  { %v636_v63 = vadd.f32 1.0, %v1378_v57  ;;  %1387 = verf.f32 %v513_v54  ;;  %v1792_v55 = vadd.f32 %v300_v60, %v1722_v9  ;;  %v302_v1 = vpop.f32.mrb[21].mxu0  ;;  %904 = vmatprep.mubr.f32.mxu1 %v698_v56 }
 0x157   :  { %1389 = verf.f32 %v514_v59  ;;  %v1796_v53 = vadd.f32 %v302_v1, %v1724_v10  ;;  %905 = vmatmul.mubr.f32.gmra.mrb[2].mxu1 %v697_v61  ;;  %v699_v13 = vmul.f32 %v635_v58, %v443_v2 }
 0x158   :  { %v1380_v3 = vpop.eup %1379  ;;  %v515_v4 = vmul.f32 0.70710677, %v1792_v55  ;;  %v700_v6 = vmul.f32 %v636_v63, %v444_v62  ;;  %v451_v60 = vmul.f32 0.5, %v1792_v55 }
 0x159   :  { %v1382_v7 = vpop.eup %1381  ;;  %v637_v8 = vadd.f32 1.0, %v1380_v3  ;;  %v516_v11 = vmul.f32 0.70710677, %v1796_v53  ;;  %v306_v12 = vpop.f32.mrb[22].mxu0  ;;  %v452_v57 = vmul.f32 0.5, %v1796_v53 }
 0x15a   :  { %v638_v14 = vadd.f32 1.0, %v1382_v7  ;;  %1391 = verf.f32 %v515_v4  ;;  %v1802_v5 = vadd.f32 %v306_v12, %v1722_v9  ;;  %v308_v15 = vpop.f32.mrb[23].mxu0  ;;  %909 = vmatprep.mubr.f32.mxu1 %v700_v6 }
 0x15b   :  { %1393 = verf.f32 %v516_v11  ;;  %v1806_v17 = vadd.f32 %v308_v15, %v1724_v10  ;;  %910 = vmatmul.mubr.f32.gmra.mrb[4].mxu1 %v699_v13  ;;  %v701_v26 = vmul.f32 %v637_v8, %v445_v16 }
 0x15c   :  { %v1384_v18 = vpop.eup %1383  ;;  %v517_v19 = vmul.f32 0.70710677, %v1802_v5  ;;  %v702_v21 = vmul.f32 %v638_v14, %v446_v0  ;;  %v453_v12 = vmul.f32 0.5, %v1802_v5 }
 0x15d   :  { %v1386_v22 = vpop.eup %1385  ;;  %v639_v23 = vadd.f32 1.0, %v1384_v18  ;;  %v518_v24 = vmul.f32 0.70710677, %v1806_v17  ;;  %v312_v25 = vpop.f32.mrb[24].mxu0  ;;  %v454_v7 = vmul.f32 0.5, %v1806_v17 }
 0x15e   :  { %v640_v28 = vadd.f32 1.0, %v1386_v22  ;;  %1395 = verf.f32 %v517_v19  ;;  %v1812_v20 = vadd.f32 %v312_v25, %v1722_v9  ;;  %v314_v30 = vpop.f32.mrb[25].mxu0  ;;  %914 = vmatprep.mubr.f32.mxu1 %v702_v21 }
 0x15f   :  { %1397 = verf.f32 %v518_v24  ;;  %v1816_v32 = vadd.f32 %v314_v30, %v1724_v10  ;;  %915 = vmatmul.mubr.f32.gmra.mrb[6].mxu1 %v701_v26  ;;  %v703_v41 = vmul.f32 %v639_v23, %v447_v31 }
 0x160   :  { %v1388_v29 = vpop.eup %1387  ;;  %v519_v34 = vmul.f32 0.70710677, %v1812_v20  ;;  %v704_v35 = vmul.f32 %v640_v28, %v448_v27  ;;  %v455_v25 = vmul.f32 0.5, %v1812_v20 }
 0x161   :  { %v1390_v36 = vpop.eup %1389  ;;  %v641_v37 = vadd.f32 1.0, %v1388_v29  ;;  %v520_v38 = vmul.f32 0.70710677, %v1816_v32  ;;  %v318_v39 = vpop.f32.mrb[26].mxu0  ;;  %v456_v22 = vmul.f32 0.5, %v1816_v32 }
 0x162   :  { %v642_v44 = vadd.f32 1.0, %v1390_v36  ;;  %1399 = verf.f32 %v519_v34  ;;  %v1822_v33 = vadd.f32 %v318_v39, %v1722_v9  ;;  %v320_v45 = vpop.f32.mrb[27].mxu0  ;;  %919 = vmatprep.mubr.f32.mxu1 %v704_v35 }
 0x163   :  { %1401 = verf.f32 %v520_v38  ;;  %v1826_v47 = vadd.f32 %v320_v45, %v1724_v10  ;;  %920 = vmatmul.mubr.f32.gmra.mrb[8].mxu1 %v703_v41  ;;  %v705_v56 = vmul.f32 %v641_v37, %v449_v46 }
 0x164   :  { %v1392_v43 = vpop.eup %1391  ;;  %v521_v48 = vmul.f32 0.70710677, %v1822_v33  ;;  %v706_v49 = vmul.f32 %v642_v44, %v450_v42  ;;  %v457_v39 = vmul.f32 0.5, %v1822_v33 }
 0x165   :  { %v1394_v50 = vpop.eup %1393  ;;  %v643_v51 = vadd.f32 1.0, %v1392_v43  ;;  %v522_v52 = vmul.f32 0.70710677, %v1826_v47  ;;  %v324_v54 = vpop.f32.mrb[28].mxu0  ;;  %v458_v36 = vmul.f32 0.5, %v1826_v47 }
 0x166   :  { %v644_v58 = vadd.f32 1.0, %v1394_v50  ;;  %1403 = verf.f32 %v521_v48  ;;  %v1832_v40 = vadd.f32 %v324_v54, %v1722_v9  ;;  %v326_v59 = vpop.f32.mrb[29].mxu0  ;;  %924 = vmatprep.mubr.f32.mxu1 %v706_v49 }
 0x167   :  { %1405 = verf.f32 %v522_v52  ;;  %v1836_v61 = vadd.f32 %v326_v59, %v1724_v10  ;;  %925 = vmatmul.mubr.f32.gmra.mrb[10].mxu1 %v705_v56  ;;  %v707_v6 = vmul.f32 %v643_v51, %v451_v60 }
 0x168   :  { %v1396_v62 = vpop.eup %1395  ;;  %v523_v63 = vmul.f32 0.70710677, %v1832_v40  ;;  %v708_v1 = vmul.f32 %v644_v58, %v452_v57  ;;  %v459_v54 = vmul.f32 0.5, %v1832_v40 }
 0x169   :  { %v1398_v2 = vpop.eup %1397  ;;  %v645_v53 = vadd.f32 1.0, %v1396_v62  ;;  %v524_v3 = vmul.f32 0.70710677, %v1836_v61  ;;  %v330_v4 = vpop.f32.mrb[30].mxu0  ;;  %v460_v50 = vmul.f32 0.5, %v1836_v61 }
 0x16a   :  { %v646_v8 = vadd.f32 1.0, %v1398_v2  ;;  %1407 = verf.f32 %v523_v63  ;;  %v1842_v55 = vadd.f32 %v330_v4, %v1722_v9  ;;  %v332_v11 = vpop.f32.mrb[31].mxu0  ;;  %929 = vmatprep.mubr.f32.mxu1 %v708_v1 }
 0x16b   :  { %1409 = verf.f32 %v524_v3  ;;  %v1846_v13 = vadd.f32 %v332_v11, %v1724_v10  ;;  %930 = vmatmul.mubr.f32.gmra.mrb[12].mxu1 %v707_v6  ;;  %v709_v21 = vmul.f32 %v645_v53, %v453_v12 }
 0x16c   :  { %v1400_v0 = vpop.eup %1399  ;;  %v525_v14 = vmul.f32 0.70710677, %v1842_v55  ;;  %v710_v15 = vmul.f32 %v646_v8, %v454_v7  ;;  %v461_v4 = vmul.f32 0.5, %v1842_v55 }
 0x16d   :  { %v1402_v16 = vpop.eup %1401  ;;  %v647_v17 = vadd.f32 1.0, %v1400_v0  ;;  %v526_v18 = vmul.f32 0.70710677, %v1846_v13  ;;  %v336_v19 = vpop.f32.mrb[32].mxu0  ;;  %v462_v2 = vmul.f32 0.5, %v1846_v13 }
 0x16e   :  { %v648_v23 = vadd.f32 1.0, %v1402_v16  ;;  %1411 = verf.f32 %v525_v14  ;;  %v1852_v5 = vadd.f32 %v336_v19, %v1722_v9  ;;  %v338_v24 = vpop.f32.mrb[33].mxu0  ;;  %934 = vmatprep.mubr.f32.mxu1 %v710_v15 }
 0x16f   :  { %1413 = verf.f32 %v526_v18  ;;  %v1856_v26 = vadd.f32 %v338_v24, %v1724_v10  ;;  %935 = vmatmul.mubr.f32.gmra.mrb[14].mxu1 %v709_v21  ;;  %v711_v35 = vmul.f32 %v647_v17, %v455_v25 }
 0x170   :  { %v1404_v27 = vpop.eup %1403  ;;  %v527_v28 = vmul.f32 0.70710677, %v1852_v5  ;;  %v712_v30 = vmul.f32 %v648_v23, %v456_v22  ;;  %v463_v19 = vmul.f32 0.5, %v1852_v5 }
 0x171   :  { %v1406_v31 = vpop.eup %1405  ;;  %v649_v32 = vadd.f32 1.0, %v1404_v27  ;;  %v528_v29 = vmul.f32 0.70710677, %v1856_v26  ;;  %v342_v34 = vpop.f32.mrb[34].mxu0  ;;  %v464_v16 = vmul.f32 0.5, %v1856_v26 }
 0x172   :  { %v650_v37 = vadd.f32 1.0, %v1406_v31  ;;  %1415 = verf.f32 %v527_v28  ;;  %v1862_v20 = vadd.f32 %v342_v34, %v1722_v9  ;;  %v344_v38 = vpop.f32.mrb[35].mxu0  ;;  %939 = vmatprep.mubr.f32.mxu1 %v712_v30 }
 0x173   :  { %1417 = verf.f32 %v528_v29  ;;  %v1866_v41 = vadd.f32 %v344_v38, %v1724_v10  ;;  %940 = vmatmul.mubr.f32.gmra.mrb[16].mxu1 %v711_v35  ;;  %v713_v49 = vmul.f32 %v649_v32, %v457_v39 }
 0x174   :  { %v1408_v42 = vpop.eup %1407  ;;  %v529_v44 = vmul.f32 0.70710677, %v1862_v20  ;;  %v714_v45 = vmul.f32 %v650_v37, %v458_v36  ;;  %v465_v34 = vmul.f32 0.5, %v1862_v20 }
 0x175   :  { %v1410_v46 = vpop.eup %1409  ;;  %v651_v47 = vadd.f32 1.0, %v1408_v42  ;;  %v530_v43 = vmul.f32 0.70710677, %v1866_v41  ;;  %v348_v48 = vpop.f32.mrb[36].mxu0  ;;  %v466_v31 = vmul.f32 0.5, %v1866_v41 }
 0x176   :  { %v652_v51 = vadd.f32 1.0, %v1410_v46  ;;  %1419 = verf.f32 %v529_v44  ;;  %v1872_v33 = vadd.f32 %v348_v48, %v1722_v9  ;;  %v350_v52 = vpop.f32.mrb[37].mxu0  ;;  %944 = vmatprep.mubr.f32.mxu1 %v714_v45 }
 0x177   :  { %1421 = verf.f32 %v530_v43  ;;  %v1876_v56 = vadd.f32 %v350_v52, %v1724_v10  ;;  %945 = vmatmul.mubr.f32.gmra.mrb[18].mxu1 %v713_v49  ;;  %v715_v1 = vmul.f32 %v651_v47, %v459_v54 }
 0x178   :  { %v1412_v57 = vpop.eup %1411  ;;  %v531_v58 = vmul.f32 0.70710677, %v1872_v33  ;;  %v716_v59 = vmul.f32 %v652_v51, %v460_v50  ;;  %v467_v48 = vmul.f32 0.5, %v1872_v33 }
 0x179   :  { %v1414_v60 = vpop.eup %1413  ;;  %v653_v61 = vadd.f32 1.0, %v1412_v57  ;;  %v532_v62 = vmul.f32 0.70710677, %v1876_v56  ;;  %v354_v63 = vpop.f32.mrb[38].mxu0  ;;  %v468_v46 = vmul.f32 0.5, %v1876_v56 }
 0x17a   :  { %v654_v53 = vadd.f32 1.0, %v1414_v60  ;;  %1423 = verf.f32 %v531_v58  ;;  %v1882_v40 = vadd.f32 %v354_v63, %v1722_v9  ;;  %v356_v3 = vpop.f32.mrb[39].mxu0  ;;  %949 = vmatprep.mubr.f32.mxu1 %v716_v59 }
 0x17b   :  { %1425 = verf.f32 %v532_v62  ;;  %v1886_v6 = vadd.f32 %v356_v3, %v1724_v10  ;;  %950 = vmatmul.mubr.f32.gmra.mrb[20].mxu1 %v715_v1  ;;  %v717_v15 = vmul.f32 %v653_v61, %v461_v4 }
 0x17c   :  { %v1416_v7 = vpop.eup %1415  ;;  %v533_v8 = vmul.f32 0.70710677, %v1882_v40  ;;  %v718_v11 = vmul.f32 %v654_v53, %v462_v2  ;;  %v469_v63 = vmul.f32 0.5, %v1882_v40 }
 0x17d   :  { %v1418_v12 = vpop.eup %1417  ;;  %v655_v13 = vadd.f32 1.0, %v1416_v7  ;;  %v534_v0 = vmul.f32 0.70710677, %v1886_v6  ;;  %v360_v14 = vpop.f32.mrb[40].mxu0  ;;  %v470_v60 = vmul.f32 0.5, %v1886_v6 }
 0x17e   :  { %v656_v17 = vadd.f32 1.0, %v1418_v12  ;;  %1427 = verf.f32 %v533_v8  ;;  %v1892_v55 = vadd.f32 %v360_v14, %v1722_v9  ;;  %v362_v18 = vpop.f32.mrb[41].mxu0  ;;  %954 = vmatprep.mubr.f32.mxu1 %v718_v11 }
 0x17f   :  { %1429 = verf.f32 %v534_v0  ;;  %v1896_v21 = vadd.f32 %v362_v18, %v1724_v10  ;;  %955 = vmatmul.mubr.f32.gmra.mrb[22].mxu1 %v717_v15  ;;  %v719_v30 = vmul.f32 %v655_v13, %v463_v19 }
 0x180   :  { %v1420_v22 = vpop.eup %1419  ;;  %v535_v23 = vmul.f32 0.70710677, %v1892_v55  ;;  %v720_v24 = vmul.f32 %v656_v17, %v464_v16  ;;  %v471_v14 = vmul.f32 0.5, %v1892_v55 }
 0x181   :  { %v1422_v25 = vpop.eup %1421  ;;  %v657_v26 = vadd.f32 1.0, %v1420_v22  ;;  %v536_v27 = vmul.f32 0.70710677, %v1896_v21  ;;  %v366_v28 = vpop.f32.mrb[42].mxu0  ;;  %v472_v12 = vmul.f32 0.5, %v1896_v21 }
 0x182   :  { %v658_v32 = vadd.f32 1.0, %v1422_v25  ;;  %1431 = verf.f32 %v535_v23  ;;  %v1902_v5 = vadd.f32 %v366_v28, %v1722_v9  ;;  %v368_v29 = vpop.f32.mrb[43].mxu0  ;;  %959 = vmatprep.mubr.f32.mxu1 %v720_v24 }
 0x183   :  { %1433 = verf.f32 %v536_v27  ;;  %v1906_v35 = vadd.f32 %v368_v29, %v1724_v10  ;;  %960 = vmatmul.mubr.f32.gmra.mrb[24].mxu1 %v719_v30  ;;  %v721_v45 = vmul.f32 %v657_v26, %v465_v34 }
 0x184   :  { %v1424_v36 = vpop.eup %1423  ;;  %v537_v37 = vmul.f32 0.70710677, %v1902_v5  ;;  %v722_v38 = vmul.f32 %v658_v32, %v466_v31  ;;  %v473_v28 = vmul.f32 0.5, %v1902_v5 }
 0x185   :  { %v1426_v39 = vpop.eup %1425  ;;  %v659_v41 = vadd.f32 1.0, %v1424_v36  ;;  %v538_v42 = vmul.f32 0.70710677, %v1906_v35  ;;  %v372_v44 = vpop.f32.mrb[44].mxu0  ;;  %v474_v25 = vmul.f32 0.5, %v1906_v35 }
 0x186   :  { %v660_v47 = vadd.f32 1.0, %v1426_v39  ;;  %1435 = verf.f32 %v537_v37  ;;  %v1912_v20 = vadd.f32 %v372_v44, %v1722_v9  ;;  %v374_v43 = vpop.f32.mrb[45].mxu0  ;;  %964 = vmatprep.mubr.f32.mxu1 %v722_v38 }
 0x187   :  { %1437 = verf.f32 %v538_v42  ;;  %v1916_v49 = vadd.f32 %v374_v43, %v1724_v10  ;;  %965 = vmatmul.mubr.f32.gmra.mrb[26].mxu1 %v721_v45  ;;  %v723_v59 = vmul.f32 %v659_v41, %v467_v48 }
 0x188   :  { %v1428_v50 = vpop.eup %1427  ;;  %v539_v51 = vmul.f32 0.70710677, %v1912_v20  ;;  %v724_v52 = vmul.f32 %v660_v47, %v468_v46  ;;  %v475_v44 = vmul.f32 0.5, %v1912_v20 }
 0x189   :  { %v1430_v54 = vpop.eup %1429  ;;  %v661_v56 = vadd.f32 1.0, %v1428_v50  ;;  %v540_v57 = vmul.f32 0.70710677, %v1916_v49  ;;  %v378_v58 = vpop.f32.mrb[46].mxu0  ;;  %v476_v39 = vmul.f32 0.5, %v1916_v49 }
 0x18a   :  { %v662_v61 = vadd.f32 1.0, %v1430_v54  ;;  %1439 = verf.f32 %v539_v51  ;;  %v1922_v33 = vadd.f32 %v378_v58, %v1722_v9  ;;  %v380_v62 = vpop.f32.mrb[47].mxu0  ;;  %969 = vmatprep.mubr.f32.mxu1 %v724_v52 }
 0x18b   :  { %1441 = verf.f32 %v540_v57  ;;  %v1926_v1 = vadd.f32 %v380_v62, %v1724_v10  ;;  %970 = vmatmul.mubr.f32.gmra.mrb[28].mxu1 %v723_v59  ;;  %v725_v11 = vmul.f32 %v661_v56, %v469_v63 }
 0x18c   :  { %v1432_v2 = vpop.eup %1431  ;;  %v541_v53 = vmul.f32 0.70710677, %v1922_v33  ;;  %v726_v3 = vmul.f32 %v662_v61, %v470_v60  ;;  %v477_v58 = vmul.f32 0.5, %v1922_v33 }
 0x18d   :  { %v1434_v4 = vpop.eup %1433  ;;  %v663_v6 = vadd.f32 1.0, %v1432_v2  ;;  %v542_v7 = vmul.f32 0.70710677, %v1926_v1  ;;  %v384_v8 = vpop.f32.mrb[48].mxu0  ;;  %v478_v54 = vmul.f32 0.5, %v1926_v1 }
 0x18e   :  { %v664_v13 = vadd.f32 1.0, %v1434_v4  ;;  %1443 = verf.f32 %v541_v53  ;;  %v1932_v40 = vadd.f32 %v384_v8, %v1722_v9  ;;  %v386_v0 = vpop.f32.mrb[49].mxu0  ;;  %974 = vmatprep.mubr.f32.mxu1 %v726_v3 }
 0x18f   :  { %1445 = verf.f32 %v542_v7  ;;  %v1936_v15 = vadd.f32 %v386_v0, %v1724_v10  ;;  %975 = vmatmul.mubr.f32.gmra.mrb[30].mxu1 %v725_v11  ;;  %v727_v24 = vmul.f32 %v663_v6, %v471_v14 }
 0x190   :  { %v1436_v16 = vpop.eup %1435  ;;  %v543_v17 = vmul.f32 0.70710677, %v1932_v40  ;;  %v728_v18 = vmul.f32 %v664_v13, %v472_v12  ;;  %v479_v8 = vmul.f32 0.5, %v1932_v40 }
 0x191   :  { %v1438_v19 = vpop.eup %1437  ;;  %v665_v21 = vadd.f32 1.0, %v1436_v16  ;;  %v544_v22 = vmul.f32 0.70710677, %v1936_v15  ;;  %v390_v23 = vpop.f32.mrb[50].mxu0  ;;  %v480_v4 = vmul.f32 0.5, %v1936_v15 }
 0x192   :  { %v666_v26 = vadd.f32 1.0, %v1438_v19  ;;  %1447 = verf.f32 %v543_v17  ;;  %v1942_v55 = vadd.f32 %v390_v23, %v1722_v9  ;;  %v392_v27 = vpop.f32.mrb[51].mxu0  ;;  %979 = vmatprep.mubr.f32.mxu1 %v728_v18 }
 0x193   :  { %1449 = verf.f32 %v544_v22  ;;  %v1946_v30 = vadd.f32 %v392_v27, %v1724_v10  ;;  %980 = vmatmul.mubr.f32.gmra.mrb[32].mxu1 %v727_v24  ;;  %v729_v38 = vmul.f32 %v665_v21, %v473_v28 }
 0x194   :  { %v1440_v31 = vpop.eup %1439  ;;  %v545_v32 = vmul.f32 0.70710677, %v1942_v55  ;;  %v730_v29 = vmul.f32 %v666_v26, %v474_v25  ;;  %v481_v23 = vmul.f32 0.5, %v1942_v55 }
 0x195   :  { %v1442_v34 = vpop.eup %1441  ;;  %v667_v35 = vadd.f32 1.0, %v1440_v31  ;;  %v546_v36 = vmul.f32 0.70710677, %v1946_v30  ;;  %v396_v37 = vpop.f32.mrb[52].mxu0  ;;  %v482_v19 = vmul.f32 0.5, %v1946_v30 }
 0x196   :  { %v668_v41 = vadd.f32 1.0, %v1442_v34  ;;  %1451 = verf.f32 %v545_v32  ;;  %v1952_v5 = vadd.f32 %v396_v37, %v1722_v9  ;;  %v398_v42 = vpop.f32.mrb[53].mxu0  ;;  %984 = vmatprep.mubr.f32.mxu1 %v730_v29 }
 0x197   :  { %1453 = verf.f32 %v546_v36  ;;  %v1956_v45 = vadd.f32 %v398_v42, %v1724_v10  ;;  %985 = vmatmul.mubr.f32.gmra.mrb[34].mxu1 %v729_v38  ;;  %v731_v52 = vmul.f32 %v667_v35, %v475_v44 }
 0x198   :  { %v1444_v46 = vpop.eup %1443  ;;  %v547_v47 = vmul.f32 0.70710677, %v1952_v5  ;;  %v732_v43 = vmul.f32 %v668_v41, %v476_v39  ;;  %v483_v37 = vmul.f32 0.5, %v1952_v5 }
 0x199   :  { %v1446_v48 = vpop.eup %1445  ;;  %v669_v49 = vadd.f32 1.0, %v1444_v46  ;;  %v548_v50 = vmul.f32 0.70710677, %v1956_v45  ;;  %v402_v51 = vpop.f32.mrb[54].mxu0  ;;  %v484_v34 = vmul.f32 0.5, %v1956_v45 }
 0x19a   :  { %v670_v56 = vadd.f32 1.0, %v1446_v48  ;;  %1455 = verf.f32 %v547_v47  ;;  %v1962_v20 = vadd.f32 %v402_v51, %v1722_v9  ;;  %v404_v57 = vpop.f32.mrb[55].mxu0  ;;  %989 = vmatprep.mubr.f32.mxu1 %v732_v43 }
 0x19b   :  { %1457 = verf.f32 %v548_v50  ;;  %v1966_v59 = vadd.f32 %v404_v57, %v1724_v10  ;;  %990 = vmatmul.mubr.f32.gmra.mrb[36].mxu1 %v731_v52  ;;  %v733_v3 = vmul.f32 %v669_v49, %v477_v58 }
 0x19c   :  { %v1448_v60 = vpop.eup %1447  ;;  %v549_v61 = vmul.f32 0.70710677, %v1962_v20  ;;  %v734_v62 = vmul.f32 %v670_v56, %v478_v54  ;;  %v485_v5 = vmul.f32 0.5, %v1962_v20 }
 0x19d   :  { %v1450_v63 = vpop.eup %1449  ;;  %v671_v1 = vadd.f32 1.0, %v1448_v60  ;;  %v550_v2 = vmul.f32 0.70710677, %v1966_v59  ;;  %v408_v53 = vpop.f32.mrb[56].mxu0  ;;  %v486_v48 = vmul.f32 0.5, %v1966_v59 }
 0x19e   :  { %v672_v6 = vadd.f32 1.0, %v1450_v63  ;;  %1459 = verf.f32 %v549_v61  ;;  %v1972_v33 = vadd.f32 %v408_v53, %v1722_v9  ;;  %v410_v7 = vpop.f32.mrb[57].mxu0  ;;  %994 = vmatprep.mubr.f32.mxu1 %v734_v62 }
 0x19f   :  { %1461 = verf.f32 %v550_v2  ;;  %v1976_v11 = vadd.f32 %v410_v7, %v1724_v10  ;;  %995 = vmatmul.mubr.f32.gmra.mrb[38].mxu1 %v733_v3  ;;  %v735_v18 = vmul.f32 %v671_v1, %v479_v8 }
 0x1a0   :  { %v1452_v12 = vpop.eup %1451  ;;  %v551_v13 = vmul.f32 0.70710677, %v1972_v33  ;;  %v736_v0 = vmul.f32 %v672_v6, %v480_v4 }
 0x1a1   :  { %v1454_v14 = vpop.eup %1453  ;;  %v673_v15 = vadd.f32 1.0, %v1452_v12  ;;  %v552_v16 = vmul.f32 0.70710677, %v1976_v11  ;;  %v414_v17 = vpop.f32.mrb[58].mxu0  ;;  %v488_v59 = vmul.f32 0.5, %v1976_v11 }
 0x1a2   :  { %v674_v21 = vadd.f32 1.0, %v1454_v14  ;;  %1463 = verf.f32 %v551_v13  ;;  %v1982_v40 = vadd.f32 %v414_v17, %v1722_v9  ;;  %v416_v22 = vpop.f32.mrb[59].mxu0  ;;  %999 = vmatprep.mubr.f32.mxu1 %v736_v0 }
 0x1a3   :  { %1465 = verf.f32 %v552_v16  ;;  %v417_v24 = vadd.f32 %v416_v22, %v1724_v10  ;;  %1000 = vmatmul.mubr.f32.gmra.mrb[40].mxu1 %v735_v18  ;;  %v737_v29 = vmul.f32 %v673_v15, %v481_v23 }
 0x1a4   :  { %v1456_v25 = vpop.eup %1455  ;;  %v553_v26 = vmul.f32 0.70710677, %v1982_v40  ;;  %v738_v27 = vmul.f32 %v674_v21, %v482_v19  ;;  %v489_v6 = vmul.f32 0.5, %v1982_v40 }
 0x1a5   :  { %v1458_v28 = vpop.eup %1457  ;;  %v675_v31 = vadd.f32 1.0, %v1456_v25  ;;  %v554_v30 = vmul.f32 0.70710677, %v417_v24  ;;  %v420_v32 = vpop.f32.mrb[60].mxu0  ;;  %v490_v3 = vmul.f32 0.5, %v417_v24 }
 0x1a6   :  { %v676_v35 = vadd.f32 1.0, %v1458_v28  ;;  %1467 = verf.f32 %v553_v26  ;;  %v421_v36 = vadd.f32 %v420_v32, %v1722_v9  ;;  %v422_v55 = vpop.f32.mrb[61].mxu0  ;;  %1004 = vmatprep.mubr.f32.mxu1 %v738_v27  ;;  %v2001_v25 = vld [vmem:[%s2054_s4] ss:$0 sm:$0xff]  ;;  %s1582_s4 = smov [#allocation9]  }
 0x1a7   :  { %1469 = verf.f32 %v554_v30  ;;  %v423_v38 = vadd.f32 %v422_v55, %v1724_v10  ;;  %1005 = vmatmul.mubr.f32.gmra.mrb[42].mxu1 %v737_v29  ;;  %v739_v45 = vmul.f32 %v675_v31, %v483_v37  ;;  %s1215_s8 = sshll.u32 %s1582_s4, 4  ;;  %s1216_s8 = int_to_ptr.vmem [resolvable:$true] %s1215_s8 }
 0x1a8   :  { %v1460_v39 = vpop.eup %1459  ;;  %v555_v41 = vmul.f32 0.70710677, %v421_v36  ;;  %v740_v42 = vmul.f32 %v676_v35, %v484_v34  ;;  %v491_v14 = vmul.f32 0.5, %v421_v36  ;;  %s1545_s9 = scalar_lea.vmem %s1216_s8, 4096  ;;  %p1550_p11 = scmp.lt.s32.totalorder %s1216_s8, %s1216_s8 }
 0x1a9   :  { %v1462_v44 = vpop.eup %1461  ;;  %v677_v46 = vadd.f32 1.0, %v1460_v39  ;;  %v556_v47 = vmul.f32 0.70710677, %v423_v38  ;;  %v426_v43 = vpop.f32.mrb[62].mxu0  ;;  %v492_v0 = vmul.f32 0.5, %v423_v38  ;;  %p1546_p10 = scmp.ne.s32.totalorder %s1216_s8, %s1545_s9  ;;  %p1551_p12 = scmp.lt.s32.totalorder %s1545_s9, %s1545_s9 }
 0x1aa   :  { %v678_v49 = vadd.f32 1.0, %v1462_v44  ;;  %1471 = verf.f32 %v555_v41  ;;  %v427_v50 = vadd.f32 %v426_v43, %v1722_v9  ;;  %v428_v51 = vpop.f32.mrb[63].mxu0  ;;  %1009 = vmatprep.mubr.f32.mxu1 %v740_v42  ;;  %v487_v9 = vmul.f32 0.5, %v1972_v33 }
 0x1ab   :  { %1473 = verf.f32 %v556_v47  ;;  %v429_v52 = vadd.f32 %v428_v51, %v1724_v10  ;;  %1010 = vmatmul.mubr.f32.gmra.mrb[44].mxu1 %v739_v45  ;;  %v741_v62 = vmul.f32 %v677_v46, %v485_v5  ;;  %p1552_p13 = por %p1551_p12, %p1550_p11 }
 0x1ac   :  { %v1464_v54 = vpop.eup %1463  ;;  %v557_v56 = vmul.f32 0.70710677, %v427_v50  ;;  %v742_v57 = vmul.f32 %v678_v49, %v486_v48  ;;  %v493_v40 = vmul.f32 0.5, %v427_v50 }
 0x1ad   :  { %v1466_v58 = vpop.eup %1465  ;;  %v679_v60 = vadd.f32 1.0, %v1464_v54  ;;  %v558_v61 = vmul.f32 0.70710677, %v429_v52  ;;  %v494_v21 = vmul.f32 0.5, %v429_v52  ;;  %p1553_p0 = pnand %p1552_p13, %p1546_p10 }
 0x1ae   :  { %v680_v63 = vadd.f32 1.0, %v1466_v58  ;;  %1475 = verf.f32 %v557_v56  ;;  %1014 = vmatprep.mubr.f32.mxu1 %v742_v57 }
 0x1af   :  { %1477 = verf.f32 %v558_v61  ;;  %1015 = vmatmul.mubr.f32.gmra.mrb[46].mxu1 %v741_v62  ;;  %v743_v53 = vmul.f32 %v679_v60, %v487_v9 }
 0x1b0   :  { %v1468_v20 = vpop.eup %1467  ;;  %v744_v1 = vmul.f32 %v680_v63, %v488_v59 }
 0x1b1   :  { %v1470_v10 = vpop.eup %1469  ;;  %v681_v2 = vadd.f32 1.0, %v1468_v20 }
 0x1b2   :  { %v682_v4 = vadd.f32 1.0, %v1470_v10  ;;  %1019 = vmatprep.mubr.f32.mxu1 %v744_v1 }
 0x1b3   :  { %1020 = vmatmul.mubr.f32.gmra.mrb[48].mxu1 %v743_v53  ;;  %v745_v13 = vmul.f32 %v681_v2, %v489_v6 }
 0x1b4   :  { %v1472_v7 = vpop.eup %1471  ;;  %v746_v8 = vmul.f32 %v682_v4, %v490_v3 }
 0x1b5   :  { %v1474_v11 = vpop.eup %1473  ;;  %v683_v12 = vadd.f32 1.0, %v1472_v7 }
 0x1b6   :  { %v684_v33 = vadd.f32 1.0, %v1474_v11  ;;  %1024 = vmatprep.mubr.f32.mxu1 %v746_v8 }
 0x1b7   :  { %1025 = vmatmul.mubr.f32.gmra.mrb[50].mxu1 %v745_v13  ;;  %v747_v19 = vmul.f32 %v683_v12, %v491_v14 }
 0x1b8   :  { %v1476_v15 = vpop.eup %1475  ;;  %v748_v16 = vmul.f32 %v684_v33, %v492_v0 }
 0x1b9   :  { %v1478_v17 = vpop.eup %1477  ;;  %v685_v18 = vadd.f32 1.0, %v1476_v15 }
 0x1ba   :  { %v686_v22 = vadd.f32 1.0, %v1478_v17  ;;  %1029 = vmatprep.mubr.f32.mxu1 %v748_v16 }
 0x1bb   :  { %1030 = vmatmul.mubr.f32.gmra.mrb[52].mxu1 %v747_v19  ;;  %v749_v24 = vmul.f32 %v685_v18, %v493_v40 }
 0x1bc   :  { %v750_v23 = vmul.f32 %v686_v22, %v494_v21 }
 0x1be   :  { %1034 = vmatprep.mubr.f32.mxu1 %v750_v23 }
 0x1bf   :  { %1035 = vmatmul.mubr.f32.gmra.mrb[54].mxu1 %v749_v24 }
 0x216   :  { %v881_v26 = vpop.f32.mrb[64].mxu0 }
 0x217   :  { %v1146_v27 = vadd.f32 %v2001_v25, %v881_v26  ;;  %v883_v28 = vpop.f32.mrb[65].mxu0 }
 0x219   :  { %1178 = vst [vmem:[#allocation9] sm:$0xff] %v1146_v27 }
 0x21a   :  { %v886_v31 = vpop.f32.mrb[66].mxu0 }
 0x21b   :  { %v1147_v30 = vadd.f32 %v2001_v25, %v886_v31  ;;  %v888_v32 = vpop.f32.mrb[67].mxu0 }
 0x21d   :  { %1179 = vst [vmem:[#allocation9 + $0x8] sm:$0xff] %v1147_v30 }
 0x21e   :  { %v891_v29 = vpop.f32.mrb[68].mxu0 }
 0x21f   :  { %v1148_v34 = vadd.f32 %v2001_v25, %v891_v29  ;;  %v893_v35 = vpop.f32.mrb[69].mxu0 }
 0x221   :  { %1180 = vst [vmem:[#allocation9 + $0x10] sm:$0xff] %v1148_v34 }
 0x222   :  { %v896_v36 = vpop.f32.mrb[70].mxu0 }
 0x223   :  { %v1149_v55 = vadd.f32 %v2001_v25, %v896_v36  ;;  %v898_v37 = vpop.f32.mrb[71].mxu0 }
 0x225   :  { %1181 = vst [vmem:[#allocation9 + $0x18] sm:$0xff] %v1149_v55 }
 0x226   :  { %v901_v38 = vpop.f32.mrb[0].mxu1 }
 0x227   :  { %v1150_v39 = vadd.f32 %v2001_v25, %v901_v38  ;;  %v903_v41 = vpop.f32.mrb[1].mxu1 }
 0x229   :  { %1182 = vst [vmem:[#allocation9 + $0x20] sm:$0xff] %v1150_v39 }
 0x22a   :  { %v906_v42 = vpop.f32.mrb[2].mxu1 }
 0x22b   :  { %v1151_v44 = vadd.f32 %v2001_v25, %v906_v42  ;;  %v908_v46 = vpop.f32.mrb[3].mxu1 }
 0x22d   :  { %1183 = vst [vmem:[#allocation9 + $0x28] sm:$0xff] %v1151_v44 }
 0x22e   :  { %v911_v47 = vpop.f32.mrb[4].mxu1 }
 0x22f   :  { %v1152_v43 = vadd.f32 %v2001_v25, %v911_v47  ;;  %v913_v45 = vpop.f32.mrb[5].mxu1 }
 0x231   :  { %1184 = vst [vmem:[#allocation9 + $0x30] sm:$0xff] %v1152_v43 }
 0x232   :  { %v916_v48 = vpop.f32.mrb[6].mxu1 }
 0x233   :  { %v1153_v49 = vadd.f32 %v2001_v25, %v916_v48  ;;  %v918_v50 = vpop.f32.mrb[7].mxu1 }
 0x235   :  { %1185 = vst [vmem:[#allocation9 + $0x38] sm:$0xff] %v1153_v49 }
 0x236   :  { %v921_v51 = vpop.f32.mrb[8].mxu1 }
 0x237   :  { %v1154_v5 = vadd.f32 %v2001_v25, %v921_v51  ;;  %v923_v52 = vpop.f32.mrb[9].mxu1 }
 0x239   :  { %1186 = vst [vmem:[#allocation9 + $0x40] sm:$0xff] %v1154_v5 }
 0x23a   :  { %v926_v54 = vpop.f32.mrb[10].mxu1 }
 0x23b   :  { %v1155_v56 = vadd.f32 %v2001_v25, %v926_v54  ;;  %v928_v57 = vpop.f32.mrb[11].mxu1 }
 0x23d   :  { %1187 = vst [vmem:[#allocation9 + $0x48] sm:$0xff] %v1155_v56 }
 0x23e   :  { %v931_v58 = vpop.f32.mrb[12].mxu1 }
 0x23f   :  { %v1156_v60 = vadd.f32 %v2001_v25, %v931_v58  ;;  %v933_v61 = vpop.f32.mrb[13].mxu1 }
 0x241   :  { %1188 = vst [vmem:[#allocation9 + $0x50] sm:$0xff] %v1156_v60 }
 0x242   :  { %v936_v62 = vpop.f32.mrb[14].mxu1 }
 0x243   :  { %v1157_v59 = vadd.f32 %v2001_v25, %v936_v62  ;;  %v938_v63 = vpop.f32.mrb[15].mxu1 }
 0x245   :  { %1189 = vst [vmem:[#allocation9 + $0x58] sm:$0xff] %v1157_v59 }
 0x246   :  { %v941_v9 = vpop.f32.mrb[16].mxu1 }
 0x247   :  { %v1158_v20 = vadd.f32 %v2001_v25, %v941_v9  ;;  %v943_v1 = vpop.f32.mrb[17].mxu1 }
 0x249   :  { %1190 = vst [vmem:[#allocation9 + $0x60] sm:$0xff] %v1158_v20 }
 0x24a   :  { %v946_v10 = vpop.f32.mrb[18].mxu1 }
 0x24b   :  { %v1159_v2 = vadd.f32 %v2001_v25, %v946_v10  ;;  %v948_v53 = vpop.f32.mrb[19].mxu1 }
 0x24d   :  { %1191 = vst [vmem:[#allocation9 + $0x68] sm:$0xff] %v1159_v2 }
 0x24e   :  { %v951_v3 = vpop.f32.mrb[20].mxu1 }
 0x24f   :  { %v1160_v4 = vadd.f32 %v2001_v25, %v951_v3  ;;  %v953_v6 = vpop.f32.mrb[21].mxu1 }
 0x251   :  { %1192 = vst [vmem:[#allocation9 + $0x70] sm:$0xff] %v1160_v4 }
 0x252   :  { %v956_v7 = vpop.f32.mrb[22].mxu1 }
 0x253   :  { %v1161_v8 = vadd.f32 %v2001_v25, %v956_v7  ;;  %v958_v11 = vpop.f32.mrb[23].mxu1 }
 0x255   :  { %1193 = vst [vmem:[#allocation9 + $0x78] sm:$0xff] %v1161_v8 }
 0x256   :  { %v961_v12 = vpop.f32.mrb[24].mxu1 }
 0x257   :  { %v1162_v13 = vadd.f32 %v2001_v25, %v961_v12  ;;  %v963_v0 = vpop.f32.mrb[25].mxu1 }
 0x259   :  { %1194 = vst [vmem:[#allocation9 + $0x80] sm:$0xff] %v1162_v13 }
 0x25a   :  { %v966_v33 = vpop.f32.mrb[26].mxu1 }
 0x25b   :  { %v1163_v14 = vadd.f32 %v2001_v25, %v966_v33  ;;  %v968_v15 = vpop.f32.mrb[27].mxu1 }
 0x25d   :  { %1195 = vst [vmem:[#allocation9 + $0x88] sm:$0xff] %v1163_v14 }
 0x25e   :  { %v971_v16 = vpop.f32.mrb[28].mxu1 }
 0x25f   :  { %v1164_v17 = vadd.f32 %v2001_v25, %v971_v16  ;;  %v973_v18 = vpop.f32.mrb[29].mxu1 }
 0x261   :  { %1196 = vst [vmem:[#allocation9 + $0x90] sm:$0xff] %v1164_v17 }
 0x262   :  { %v976_v19 = vpop.f32.mrb[30].mxu1 }
 0x263   :  { %v1165_v21 = vadd.f32 %v2001_v25, %v976_v19  ;;  %v978_v22 = vpop.f32.mrb[31].mxu1 }
 0x265   :  { %1197 = vst [vmem:[#allocation9 + $0x98] sm:$0xff] %v1165_v21 }
 0x266   :  { %v981_v40 = vpop.f32.mrb[32].mxu1 }
 0x267   :  { %v1166_v23 = vadd.f32 %v2001_v25, %v981_v40  ;;  %v983_v24 = vpop.f32.mrb[33].mxu1 }
 0x269   :  { %1198 = vst [vmem:[#allocation9 + $0xa0] sm:$0xff] %v1166_v23 }
 0x26a   :  { %v986_v26 = vpop.f32.mrb[34].mxu1 }
 0x26b   :  { %v1167_v27 = vadd.f32 %v2001_v25, %v986_v26  ;;  %v988_v28 = vpop.f32.mrb[35].mxu1 }
 0x26d   :  { %1199 = vst [vmem:[#allocation9 + $0xa8] sm:$0xff] %v1167_v27 }
 0x26e   :  { %v991_v31 = vpop.f32.mrb[36].mxu1 }
 0x26f   :  { %v1168_v30 = vadd.f32 %v2001_v25, %v991_v31  ;;  %v993_v32 = vpop.f32.mrb[37].mxu1 }
 0x271   :  { %1200 = vst [vmem:[#allocation9 + $0xb0] sm:$0xff] %v1168_v30 }
 0x272   :  { %v996_v29 = vpop.f32.mrb[38].mxu1 }
 0x273   :  { %v1169_v34 = vadd.f32 %v2001_v25, %v996_v29  ;;  %v998_v35 = vpop.f32.mrb[39].mxu1 }
 0x275   :  { %1201 = vst [vmem:[#allocation9 + $0xb8] sm:$0xff] %v1169_v34 }
 0x276   :  { %v1001_v36 = vpop.f32.mrb[40].mxu1 }
 0x277   :  { %v1170_v55 = vadd.f32 %v2001_v25, %v1001_v36  ;;  %v1003_v37 = vpop.f32.mrb[41].mxu1 }
 0x279   :  { %1202 = vst [vmem:[#allocation9 + $0xc0] sm:$0xff] %v1170_v55 }
 0x27a   :  { %v1006_v38 = vpop.f32.mrb[42].mxu1 }
 0x27b   :  { %v1171_v39 = vadd.f32 %v2001_v25, %v1006_v38  ;;  %v1008_v41 = vpop.f32.mrb[43].mxu1 }
 0x27d   :  { %1203 = vst [vmem:[#allocation9 + $0xc8] sm:$0xff] %v1171_v39 }
 0x27e   :  { %v1011_v42 = vpop.f32.mrb[44].mxu1 }
 0x27f   :  { %v1172_v44 = vadd.f32 %v2001_v25, %v1011_v42  ;;  %v1013_v46 = vpop.f32.mrb[45].mxu1 }
 0x281   :  { %1204 = vst [vmem:[#allocation9 + $0xd0] sm:$0xff] %v1172_v44 }
 0x282   :  { %v1016_v47 = vpop.f32.mrb[46].mxu1 }
 0x283   :  { %v1173_v43 = vadd.f32 %v2001_v25, %v1016_v47  ;;  %v1018_v45 = vpop.f32.mrb[47].mxu1 }
 0x285   :  { %1205 = vst [vmem:[#allocation9 + $0xd8] sm:$0xff] %v1173_v43 }
 0x286   :  { %v1021_v48 = vpop.f32.mrb[48].mxu1 }
 0x287   :  { %v1174_v49 = vadd.f32 %v2001_v25, %v1021_v48  ;;  %v1023_v50 = vpop.f32.mrb[49].mxu1 }
 0x289   :  { %1206 = vst [vmem:[#allocation9 + $0xe0] sm:$0xff] %v1174_v49 }
 0x28a   :  { %v1026_v51 = vpop.f32.mrb[50].mxu1 }
 0x28b   :  { %v1175_v5 = vadd.f32 %v2001_v25, %v1026_v51  ;;  %v1028_v52 = vpop.f32.mrb[51].mxu1 }
 0x28d   :  { %1207 = vst [vmem:[#allocation9 + $0xe8] sm:$0xff] %v1175_v5 }
 0x28e   :  { %v1031_v54 = vpop.f32.mrb[52].mxu1 }
 0x28f   :  { %v1176_v56 = vadd.f32 %v2001_v25, %v1031_v54  ;;  %v1033_v57 = vpop.f32.mrb[53].mxu1 }
 0x291   :  { %1208 = vst [vmem:[#allocation9 + $0xf0] sm:$0xff] %v1176_v56 }
 0x292   :  { %v1036_v58 = vpop.f32.mrb[54].mxu1 }
 0x293   :  { %v1177_v60 = vadd.f32 %v2001_v25, %v1036_v58  ;;  %v1038_v61 = vpop.f32.mrb[55].mxu1 }
 0x295   :  { %1209 = vst [vmem:[#allocation9 + $0xf8] sm:$0xff] %v1177_v60 }
 0x296   :  { %1556 = shalt.err (!%p1553_p0)
}
 0x297   :  { %s1557_s12 = scalar_lea.hbm %s2055_s5, 4096 }
 0x298   :  { %p1558_p1 = scmp.ne.s32.totalorder %s2055_s5, %s1557_s12  ;;  %p1561_p2 = scmp.lt.u32.totalorder %s1557_s12, %s2055_s5 }
 0x29a   :  { %p1563_p3 = pnand %p1561_p2, %p1558_p1 }
 0x29c   :  { %1566 = shalt.err (!%p1563_p3)
}
 0x29d   :  { %1221 = dma.vmem_to_hbm [thread:$0]  %s1216_s8, 4096, %s2055_s5, [#allocation5], %s1577_s1, %s1577_s1, %s1578_s17  }
 0x29e   :  { %1571 = dma.done.wait [#allocation5], 4096  }
 0x29f   :  { %1572 = vsyncadd [#allocation5], 4294963200 }
 0x2a0   :  { %1225 = vsyncpa [#allocation4], 1 }
 0x2a1   :  { %1226 = vsyncpa [#allocation7], 1 }
 0x2a2   :  { %1227 = vsyncpa [#allocation5], 1 }

</bundles_post_ra>
